<compile_context>
chip_gen: v5e
topology: v5e:2x2
jax: 0.10.0
libtpu: 0.0.40
codegen_flags: <defaults>
</compile_context>

<pallas_src>
import functools

import jax
import jax.numpy as jnp
import numpy as np
from jax import lax
from jax.experimental import pallas as pl
from jax.experimental.pallas import tpu as pltpu


def _round_up(x, m):
    return (x + m - 1) // m * m


def _vmem_capacity_bytes():
    try:
        return int(pltpu.get_tpu_info().vmem_capacity_bytes)
    except Exception:
        return 64 * 1024 * 1024          # conservative (v7x-sized) fallback


def _vmem_budgets():
    cap = _vmem_capacity_bytes()
    if cap >= 100 * 1024 * 1024:         # v5e / v6e: 128 MiB physical VMEM
        return 48 * 1024 * 1024, 96 * 1024 * 1024
    return 22 * 1024 * 1024, 44 * 1024 * 1024   # v7x: 64 MiB physical VMEM


def _convt_fused_kernel(*refs, n_planes, taps, wc, rows, act, compute_dtype):
    # refs: n_planes x plane(1,1,Lp,Cin) f32, w(T^3,Cin,TN) cdt, b(1,TN) f32,
    #       out(1,1,rows,TN)
    plane_refs = refs[:n_planes]
    w_ref, b_ref, o_ref = refs[n_planes], refs[n_planes + 1], refs[n_planes + 2]
    tn = o_ref.shape[-1]

    acc = jnp.zeros((rows, tn), jnp.float32)
    for t, (td, th, tw) in enumerate(taps):
        off = th * wc + tw                                    # static python int
        patch = plane_refs[td][0, 0, off:off + rows, :]       # (rows, Cin) f32
        acc = acc + jnp.dot(patch.astype(compute_dtype), w_ref[t],
                            preferred_element_type=jnp.float32)
    acc = acc + b_ref[...].astype(jnp.float32)

    if act == "relu":
        acc = jnp.maximum(acc, 0.0)
    elif act == "lrelu":
        acc = jnp.where(acc > 0, acc, 0.2 * acc)              # LeakyReLU(0.2)
    elif act == "sigmoid":
        acc = jax.nn.sigmoid(acc)

    o_ref[0, 0] = acc.astype(o_ref.dtype)


def convt3d_block(x_ncdhw, weight, bias, *, kernel_size=3, stride=2,
                  padding=2, output_padding=1, act=None,
                  compute_dtype=jnp.bfloat16):
    """Forward of ConvT3DBlock (batch_norm=False, layer_norm=False).

    x_ncdhw: (N, Cin, D, H, W)   weight: (Cin, Cout, K, K, K)   bias: (Cout,)
    Returns: (N, Cout, OD, OH, OW), O* = (I*-1)*stride - 2*pad + K + out_pad.
    compute_dtype: dtype of the MXU operands (default bf16; accumulation f32).
    """
    if act not in (None, "relu", "lrelu", "sigmoid"):
        raise NotImplementedError(f"unsupported activation: {act!r}")

    N, CIN, D, H, W = x_ncdhw.shape
    K, s = kernel_size, stride
    COUT = weight.shape[1]
    OD = (D - 1) * s - 2 * padding + K + output_padding
    OH = (H - 1) * s - 2 * padding + K + output_padding
    OW = (W - 1) * s - 2 * padding + K + output_padding
    lo = K - 1 - padding            # left pad of the classical dilated lowering

    # ---- static sub-pixel (parity) tap decomposition, per spatial dim ------
    all_t = []
    for r in range(s):
        for k in range(K):
            if (r + k - lo) % s == 0:
                all_t.append((r + k - lo) // s)
    t_min, t_max = (min(all_t), max(all_t)) if all_t else (0, 0)
    T = t_max - t_min + 1           # taps per dim (2 for k=3, s=2, p=2, op=1)

    # per-dim selection matrix  S[tap_idx, parity, original_kernel_idx]
    S = np.zeros((T, s, K), np.float32)
    for r in range(s):
        for k in range(K):
            if (r + k - lo) % s == 0:
                t = (r + k - lo) // s
                S[t - t_min, r, K - 1 - k] += 1.0   # K-1-k: flipped kernel

    Cd, Ch, Cw = -(-OD // s), -(-OH // s), -(-OW // s)   # coarse output extents
    base = max(t_min, 0)
    padl = max(0, -t_min)
    Cdp, Hc, Wc = Cd + T - 1, Ch + T - 1, Cw + T - 1     # coarse extents + halo
    pad_d = max(0, base + Cdp - padl - D)
    pad_h = max(0, base + Hc - padl - H)
    pad_w = max(0, base + Wc - padl - W)

    NOUT = (s ** 3) * COUT
    NOUT_pad = _round_up(NOUT, 128)          # lane-dense output width
    ROWS = Hc * Wc                           # GEMM rows per (n, cd) tile
    ROWS_pad = _round_up(ROWS, 8)
    max_off = (T - 1) * Wc + (T - 1)         # largest static tap offset
    Lp = _round_up(max_off + ROWS_pad, 8)    # plane rows incl. zero tail

    cdt = jnp.dtype(compute_dtype)
    out_dtype = x_ncdhw.dtype

    # ---- layout glue only: NCDHW -> plane-major (N, Cdp, Lp, Cin), f32 ------
    # Planes stay f32 so the odd in-kernel tap offsets slice an unpacked
    # layout; patches are cast to compute_dtype inside the kernel.
    x = jnp.transpose(x_ncdhw, (0, 2, 3, 4, 1)).astype(jnp.float32)   # NDHWC
    xp = jnp.pad(x, ((0, 0), (padl, pad_d), (padl, pad_h), (padl, pad_w), (0, 0)))
    xc = xp[:, base:base + Cdp, base:base + Hc, base:base + Wc, :]
    x3 = xc.reshape(N, Cdp, ROWS, CIN)
    x3 = jnp.pad(x3, ((0, 0), (0, 0), (0, Lp - ROWS), (0, 0)))

    # ---- fold weights per (td,th,tw) tap and per output parity --------------
    # Wt[(td,th,tw)][cin, (rd,rh,rw,cout)]
    Wfold = jnp.einsum("adk,bel,cfm,ioklm->abcidefo",
                       S, S, S, weight.astype(jnp.float32))
    Wt = Wfold.reshape(T ** 3, CIN, NOUT)
    Wt = jnp.pad(Wt, ((0, 0), (0, 0), (0, NOUT_pad - NOUT))).astype(cdt)
    b2 = jnp.pad(jnp.tile(bias.astype(jnp.float32), s ** 3),
                 (0, NOUT_pad - NOUT)).reshape(1, NOUT_pad)

    # ---- VMEM-budgeted NOUT tiling (generation aware) -----------------------
    tile_budget, vmem_limit = _vmem_budgets()
    out_size = jnp.dtype(out_dtype).itemsize

    def footprint(tn):
        planes = T * 2 * Lp * CIN * 4                 # T taps, double-buffered
        wbytes = (T ** 3) * CIN * tn * cdt.itemsize   # single-buffered weights
        obytes = 2 * ROWS_pad * tn * out_size         # double-buffered output
        accb = ROWS_pad * tn * 4                      # in-kernel f32 accumulator
        return planes + wbytes + obytes + accb + 2 * tn * 4

    TN = 128
    for cand in range(NOUT_pad, 127, -128):
        if NOUT_pad % cand == 0 and footprint(cand) <= tile_budget:
            TN = cand
            break
    NB = NOUT_pad // TN

    taps = [(td, th, tw) for td in range(T) for th in range(T) for tw in range(T)]

    def plane_index_map(t):
        return lambda j, n, d: (n, d + t, 0, 0)

    kernel = functools.partial(
        _convt_fused_kernel, n_planes=T, taps=taps, wc=Wc, rows=ROWS_pad,
        act=act, compute_dtype=cdt)

    def _run(single_buffer):
        def _const_spec(shape, index_map):
            if single_buffer:
                return pl.BlockSpec(shape, index_map,
                                    pipeline_mode=pl.Buffered(1))
            return pl.BlockSpec(shape, index_map)

        in_specs = ([pl.BlockSpec((1, 1, Lp, CIN), plane_index_map(t))
                     for t in range(T)]
                    + [_const_spec((T ** 3, CIN, TN), lambda j, n, d: (0, 0, j)),
                       _const_spec((1, TN), lambda j, n, d: (0, j))])
        out_spec = pl.BlockSpec((1, 1, ROWS_pad, TN), lambda j, n, d: (n, d, 0, j))

        return pl.pallas_call(
            kernel,
            out_shape=jax.ShapeDtypeStruct((N, Cd, ROWS_pad, NOUT_pad), out_dtype),
            grid=(NB, N, Cd),
            in_specs=in_specs,
            out_specs=out_spec,
            compiler_params=pltpu.CompilerParams(
                dimension_semantics=("parallel", "parallel", "parallel"),
                vmem_limit_bytes=vmem_limit),
        )(*([x3] * T), Wt, b2)

    want_single = (NB == 1)     # weight/bias block index constant -> 1 buffer
    try:
        out_flat = _run(want_single)
    except Exception:
        if not want_single:
            raise
        out_flat = _run(False)  # fallback: default double buffering

    # ---- de-interleave parities, drop halo rows / padded columns, to NCDHW --
    o = out_flat[:, :, :ROWS, :NOUT].reshape(N, Cd, Hc, Wc, s, s, s, COUT)
    o = o[:, :, :Ch, :Cw]                                  # drop H/W halo rows
    o = jnp.transpose(o, (0, 7, 1, 4, 2, 5, 3, 6))         # (N,Cout,Cd,s,Ch,s,Cw,s)
    o = o.reshape(N, COUT, Cd * s, Ch * s, Cw * s)
    return o[:, :, :OD, :OH, :OW]


if __name__ == "__main__":
    key = jax.random.PRNGKey(0)
    k1, k2, k3 = jax.random.split(key, 3)

    N, CIN, COUT, SP, K = 2, 4, 8, 8, 3
    x = jax.random.normal(k1, (N, CIN, SP, SP, SP), jnp.float32)
    bound = 1.0 / np.sqrt(CIN * K ** 3)
    weight = jax.random.uniform(k2, (CIN, COUT, K, K, K), jnp.float32,
                                -bound, bound)
    bias = jax.random.uniform(k3, (COUT,), jnp.float32, -bound, bound)

    # Independent reference: conv-transpose via lhs-dilated regular conv.
    x_ndhwc = jnp.transpose(x, (0, 2, 3, 4, 1))
    wflip = jnp.flip(jnp.transpose(weight, (2, 3, 4, 0, 1)), axis=(0, 1, 2))
    ref = lax.conv_general_dilated(
        x_ndhwc, wflip, window_strides=(1, 1, 1),
        padding=((0, 1), (0, 1), (0, 1)), lhs_dilation=(2, 2, 2),
        dimension_numbers=("NDHWC", "DHWIO", "NDHWC")) + bias
    ref = jnp.transpose(ref, (0, 4, 1, 2, 3))

    # f32 compute path: exact structural check (same tolerance as v2).
    out_f32 = jax.block_until_ready(
        convt3d_block(x, weight, bias, act=None, compute_dtype=jnp.float32))
    assert out_f32.shape == (N, COUT, 2 * SP - 2, 2 * SP - 2, 2 * SP - 2), out_f32.shape
    np.testing.assert_allclose(np.asarray(out_f32), np.asarray(ref),
                               rtol=1e-4, atol=1e-4)

    # default bf16 compute path (f32 accumulation): looser tolerance.
    out_bf16 = jax.block_until_ready(convt3d_block(x, weight, bias, act=None))
    np.testing.assert_allclose(np.asarray(out_bf16), np.asarray(ref),
                               rtol=2e-2, atol=2e-2)

    # fused activation check (f32 path, LeakyReLU(0.2)).
    out_act = jax.block_until_ready(
        convt3d_block(x, weight, bias, act="lrelu", compute_dtype=jnp.float32))
    ref_act = jnp.where(ref > 0, ref, 0.2 * ref)
    np.testing.assert_allclose(np.asarray(out_act), np.asarray(ref_act),
                               rtol=1e-4, atol=1e-4)

    print("KERNEL_OK")
</pallas_src>

<mosaic_0001>
module attributes {stable_mosaic.version = 11 : i64} {
  func.func @_convt_fused_kernel(%arg0: i32, %arg1: i32, %arg2: i32, %arg3: memref<1x1x80x4xf32, #tpu.memory_space<vmem>>, %arg4: memref<1x1x80x4xf32, #tpu.memory_space<vmem>>, %arg5: memref<8x4x128xf32, #tpu.memory_space<vmem>>, %arg6: memref<1x128xf32, #tpu.memory_space<vmem>>, %arg7: memref<1x1x64x128xf32, #tpu.memory_space<vmem>>) attributes {dimension_semantics = [#tpu.dimension_semantics<parallel>, #tpu.dimension_semantics<parallel>, #tpu.dimension_semantics<parallel>], iteration_bounds = array<i64: 1, 2, 7>, scalar_prefetch = 0 : i64, scratch_operands = 0 : i64, tpu.core_type = #tpu.core_type<tc>, window_params = [{transform_indices = @transform_0, window_bounds = array<i64: 1, 1, 80, 4>}, {transform_indices = @transform_1, window_bounds = array<i64: 1, 1, 80, 4>}, {pipeline_mode = #tpu.pipeline_mode<synchronous>, transform_indices = @transform_2, window_bounds = array<i64: 8, 4, 128>}, {pipeline_mode = #tpu.pipeline_mode<synchronous>, transform_indices = @transform_3, window_bounds = array<i64: 1, 128>}, {transform_indices = @transform_4, window_bounds = array<i64: 1, 1, 64, 128>}]} {
    %cst = arith.constant 0.000000e+00 : f32
    %0 = vector.broadcast %cst : f32 to vector<64x128xf32>
    %c0 = arith.constant 0 : index
    %c0_0 = arith.constant 0 : index
    %c0_1 = arith.constant 0 : index
    %c0_2 = arith.constant 0 : index
    %1 = vector.load %arg3[%c0, %c0_0, %c0_1, %c0_2] : memref<1x1x80x4xf32, #tpu.memory_space<vmem>>, vector<1x1x64x4xf32>
    %2 = vector.shape_cast %1 : vector<1x1x64x4xf32> to vector<64x4xf32>
    %c0_3 = arith.constant 0 : index
    %c0_4 = arith.constant 0 : index
    %c0_5 = arith.constant 0 : index
    %3 = vector.load %arg5[%c0_3, %c0_4, %c0_5] : memref<8x4x128xf32, #tpu.memory_space<vmem>>, vector<1x4x128xf32>
    %4 = vector.shape_cast %3 : vector<1x4x128xf32> to vector<4x128xf32>
    %cst_6 = arith.constant dense<0.000000e+00> : vector<64x128xf32>
    %5 = tpu.matmul %2, %4, %cst_6 {dimension_numbers = #tpu.dot_dimension_numbers<[1], [0], [0], [1], [0, 0, 1, 1], [], []>} : vector<64x4xf32>, vector<4x128xf32>, vector<64x128xf32> -> vector<64x128xf32>
    %6 = arith.addf %0, %5 : vector<64x128xf32>
    %c0_7 = arith.constant 0 : index
    %c0_8 = arith.constant 0 : index
    %c1 = arith.constant 1 : index
    %c0_9 = arith.constant 0 : index
    %7 = vector.load %arg3[%c0_7, %c0_8, %c1, %c0_9] : memref<1x1x80x4xf32, #tpu.memory_space<vmem>>, vector<1x1x64x4xf32>
    %8 = vector.shape_cast %7 : vector<1x1x64x4xf32> to vector<64x4xf32>
    %c1_10 = arith.constant 1 : index
    %c0_11 = arith.constant 0 : index
    %c0_12 = arith.constant 0 : index
    %9 = vector.load %arg5[%c1_10, %c0_11, %c0_12] : memref<8x4x128xf32, #tpu.memory_space<vmem>>, vector<1x4x128xf32>
    %10 = vector.shape_cast %9 : vector<1x4x128xf32> to vector<4x128xf32>
    %cst_13 = arith.constant dense<0.000000e+00> : vector<64x128xf32>
    %11 = tpu.matmul %8, %10, %cst_13 {dimension_numbers = #tpu.dot_dimension_numbers<[1], [0], [0], [1], [0, 0, 1, 1], [], []>} : vector<64x4xf32>, vector<4x128xf32>, vector<64x128xf32> -> vector<64x128xf32>
    %12 = arith.addf %6, %11 : vector<64x128xf32>
    %c0_14 = arith.constant 0 : index
    %c0_15 = arith.constant 0 : index
    %c8 = arith.constant 8 : index
    %c0_16 = arith.constant 0 : index
    %13 = vector.load %arg3[%c0_14, %c0_15, %c8, %c0_16] : memref<1x1x80x4xf32, #tpu.memory_space<vmem>>, vector<1x1x64x4xf32>
    %14 = vector.shape_cast %13 : vector<1x1x64x4xf32> to vector<64x4xf32>
    %c2 = arith.constant 2 : index
    %c0_17 = arith.constant 0 : index
    %c0_18 = arith.constant 0 : index
    %15 = vector.load %arg5[%c2, %c0_17, %c0_18] : memref<8x4x128xf32, #tpu.memory_space<vmem>>, vector<1x4x128xf32>
    %16 = vector.shape_cast %15 : vector<1x4x128xf32> to vector<4x128xf32>
    %cst_19 = arith.constant dense<0.000000e+00> : vector<64x128xf32>
    %17 = tpu.matmul %14, %16, %cst_19 {dimension_numbers = #tpu.dot_dimension_numbers<[1], [0], [0], [1], [0, 0, 1, 1], [], []>} : vector<64x4xf32>, vector<4x128xf32>, vector<64x128xf32> -> vector<64x128xf32>
    %18 = arith.addf %12, %17 : vector<64x128xf32>
    %c0_20 = arith.constant 0 : index
    %c0_21 = arith.constant 0 : index
    %c9 = arith.constant 9 : index
    %c0_22 = arith.constant 0 : index
    %19 = vector.load %arg3[%c0_20, %c0_21, %c9, %c0_22] : memref<1x1x80x4xf32, #tpu.memory_space<vmem>>, vector<1x1x64x4xf32>
    %20 = vector.shape_cast %19 : vector<1x1x64x4xf32> to vector<64x4xf32>
    %c3 = arith.constant 3 : index
    %c0_23 = arith.constant 0 : index
    %c0_24 = arith.constant 0 : index
    %21 = vector.load %arg5[%c3, %c0_23, %c0_24] : memref<8x4x128xf32, #tpu.memory_space<vmem>>, vector<1x4x128xf32>
    %22 = vector.shape_cast %21 : vector<1x4x128xf32> to vector<4x128xf32>
    %cst_25 = arith.constant dense<0.000000e+00> : vector<64x128xf32>
    %23 = tpu.matmul %20, %22, %cst_25 {dimension_numbers = #tpu.dot_dimension_numbers<[1], [0], [0], [1], [0, 0, 1, 1], [], []>} : vector<64x4xf32>, vector<4x128xf32>, vector<64x128xf32> -> vector<64x128xf32>
    %24 = arith.addf %18, %23 : vector<64x128xf32>
    %c0_26 = arith.constant 0 : index
    %c0_27 = arith.constant 0 : index
    %c0_28 = arith.constant 0 : index
    %c0_29 = arith.constant 0 : index
    %25 = vector.load %arg4[%c0_26, %c0_27, %c0_28, %c0_29] : memref<1x1x80x4xf32, #tpu.memory_space<vmem>>, vector<1x1x64x4xf32>
    %26 = vector.shape_cast %25 : vector<1x1x64x4xf32> to vector<64x4xf32>
    %c4 = arith.constant 4 : index
    %c0_30 = arith.constant 0 : index
    %c0_31 = arith.constant 0 : index
    %27 = vector.load %arg5[%c4, %c0_30, %c0_31] : memref<8x4x128xf32, #tpu.memory_space<vmem>>, vector<1x4x128xf32>
    %28 = vector.shape_cast %27 : vector<1x4x128xf32> to vector<4x128xf32>
    %cst_32 = arith.constant dense<0.000000e+00> : vector<64x128xf32>
    %29 = tpu.matmul %26, %28, %cst_32 {dimension_numbers = #tpu.dot_dimension_numbers<[1], [0], [0], [1], [0, 0, 1, 1], [], []>} : vector<64x4xf32>, vector<4x128xf32>, vector<64x128xf32> -> vector<64x128xf32>
    %30 = arith.addf %24, %29 : vector<64x128xf32>
    %c0_33 = arith.constant 0 : index
    %c0_34 = arith.constant 0 : index
    %c1_35 = arith.constant 1 : index
    %c0_36 = arith.constant 0 : index
    %31 = vector.load %arg4[%c0_33, %c0_34, %c1_35, %c0_36] : memref<1x1x80x4xf32, #tpu.memory_space<vmem>>, vector<1x1x64x4xf32>
    %32 = vector.shape_cast %31 : vector<1x1x64x4xf32> to vector<64x4xf32>
    %c5 = arith.constant 5 : index
    %c0_37 = arith.constant 0 : index
    %c0_38 = arith.constant 0 : index
    %33 = vector.load %arg5[%c5, %c0_37, %c0_38] : memref<8x4x128xf32, #tpu.memory_space<vmem>>, vector<1x4x128xf32>
    %34 = vector.shape_cast %33 : vector<1x4x128xf32> to vector<4x128xf32>
    %cst_39 = arith.constant dense<0.000000e+00> : vector<64x128xf32>
    %35 = tpu.matmul %32, %34, %cst_39 {dimension_numbers = #tpu.dot_dimension_numbers<[1], [0], [0], [1], [0, 0, 1, 1], [], []>} : vector<64x4xf32>, vector<4x128xf32>, vector<64x128xf32> -> vector<64x128xf32>
    %36 = arith.addf %30, %35 : vector<64x128xf32>
    %c0_40 = arith.constant 0 : index
    %c0_41 = arith.constant 0 : index
    %c8_42 = arith.constant 8 : index
    %c0_43 = arith.constant 0 : index
    %37 = vector.load %arg4[%c0_40, %c0_41, %c8_42, %c0_43] : memref<1x1x80x4xf32, #tpu.memory_space<vmem>>, vector<1x1x64x4xf32>
    %38 = vector.shape_cast %37 : vector<1x1x64x4xf32> to vector<64x4xf32>
    %c6 = arith.constant 6 : index
    %c0_44 = arith.constant 0 : index
    %c0_45 = arith.constant 0 : index
    %39 = vector.load %arg5[%c6, %c0_44, %c0_45] : memref<8x4x128xf32, #tpu.memory_space<vmem>>, vector<1x4x128xf32>
    %40 = vector.shape_cast %39 : vector<1x4x128xf32> to vector<4x128xf32>
    %cst_46 = arith.constant dense<0.000000e+00> : vector<64x128xf32>
    %41 = tpu.matmul %38, %40, %cst_46 {dimension_numbers = #tpu.dot_dimension_numbers<[1], [0], [0], [1], [0, 0, 1, 1], [], []>} : vector<64x4xf32>, vector<4x128xf32>, vector<64x128xf32> -> vector<64x128xf32>
    %42 = arith.addf %36, %41 : vector<64x128xf32>
    %c0_47 = arith.constant 0 : index
    %c0_48 = arith.constant 0 : index
    %c9_49 = arith.constant 9 : index
    %c0_50 = arith.constant 0 : index
    %43 = vector.load %arg4[%c0_47, %c0_48, %c9_49, %c0_50] : memref<1x1x80x4xf32, #tpu.memory_space<vmem>>, vector<1x1x64x4xf32>
    %44 = vector.shape_cast %43 : vector<1x1x64x4xf32> to vector<64x4xf32>
    %c7 = arith.constant 7 : index
    %c0_51 = arith.constant 0 : index
    %c0_52 = arith.constant 0 : index
    %45 = vector.load %arg5[%c7, %c0_51, %c0_52] : memref<8x4x128xf32, #tpu.memory_space<vmem>>, vector<1x4x128xf32>
    %46 = vector.shape_cast %45 : vector<1x4x128xf32> to vector<4x128xf32>
    %cst_53 = arith.constant dense<0.000000e+00> : vector<64x128xf32>
    %47 = tpu.matmul %44, %46, %cst_53 {dimension_numbers = #tpu.dot_dimension_numbers<[1], [0], [0], [1], [0, 0, 1, 1], [], []>} : vector<64x4xf32>, vector<4x128xf32>, vector<64x128xf32> -> vector<64x128xf32>
    %48 = arith.addf %42, %47 : vector<64x128xf32>
    %c0_54 = arith.constant 0 : index
    %c0_55 = arith.constant 0 : index
    %49 = vector.load %arg6[%c0_54, %c0_55] : memref<1x128xf32, #tpu.memory_space<vmem>>, vector<1x128xf32>
    %50 = vector.broadcast %49 : vector<1x128xf32> to vector<64x128xf32>
    %51 = arith.addf %48, %50 : vector<64x128xf32>
    %c0_56 = arith.constant 0 : index
    %c0_57 = arith.constant 0 : index
    %c0_58 = arith.constant 0 : index
    %c0_59 = arith.constant 0 : index
    %52 = vector.load %arg7[%c0_56, %c0_57, %c0_58, %c0_59] : memref<1x1x64x128xf32, #tpu.memory_space<vmem>>, vector<1x1x64x128xf32>
    %53 = vector.shape_cast %52 : vector<1x1x64x128xf32> to vector<64x128xf32>
    %54 = vector.shape_cast %51 : vector<64x128xf32> to vector<1x1x64x128xf32>
    tpu.vector_store %arg7[%c0_56, %c0_57, %c0_58, %c0_59], %54 {strides = array<i32>} : memref<1x1x64x128xf32, #tpu.memory_space<vmem>>, vector<1x1x64x128xf32>,
    return
  }
  func.func @transform_0(%arg0: i32, %arg1: i32, %arg2: i32) -> (i32, i32, i32, i32) {
    %c0_i32 = arith.constant 0 : i32
    %0 = arith.addi %arg2, %c0_i32 : i32
    %c0_i32_0 = arith.constant 0 : i32
    %c0_i32_1 = arith.constant 0 : i32
    %c0_i32_2 = arith.constant 0 : i32
    return %arg1, %0, %c0_i32_0, %c0_i32_1 : i32, i32, i32, i32
  }
  func.func @transform_1(%arg0: i32, %arg1: i32, %arg2: i32) -> (i32, i32, i32, i32) {
    %c1_i32 = arith.constant 1 : i32
    %0 = arith.addi %arg2, %c1_i32 : i32
    %c0_i32 = arith.constant 0 : i32
    %c0_i32_0 = arith.constant 0 : i32
    %c0_i32_1 = arith.constant 0 : i32
    return %arg1, %0, %c0_i32, %c0_i32_0 : i32, i32, i32, i32
  }
  func.func @transform_2(%arg0: i32, %arg1: i32, %arg2: i32) -> (i32, i32, i32) {
    %c0_i32 = arith.constant 0 : i32
    %c0_i32_0 = arith.constant 0 : i32
    %c0_i32_1 = arith.constant 0 : i32
    return %c0_i32, %c0_i32_0, %arg0 : i32, i32, i32
  }
  func.func @transform_3(%arg0: i32, %arg1: i32, %arg2: i32) -> (i32, i32) {
    %c0_i32 = arith.constant 0 : i32
    %c0_i32_0 = arith.constant 0 : i32
    return %c0_i32, %arg0 : i32, i32
  }
  func.func @transform_4(%arg0: i32, %arg1: i32, %arg2: i32) -> (i32, i32, i32, i32) {
    %c0_i32 = arith.constant 0 : i32
    %c0_i32_0 = arith.constant 0 : i32
    return %arg1, %arg2, %c0_i32, %arg0 : i32, i32, i32, i32
  }
}

module attributes {stable_mosaic.version = 11 : i64} {
  func.func @_convt_fused_kernel(%arg0: i32, %arg1: i32, %arg2: i32, %arg3: memref<1x1x80x4xf32, #tpu.memory_space<vmem>>, %arg4: memref<1x1x80x4xf32, #tpu.memory_space<vmem>>, %arg5: memref<8x4x128xf32, #tpu.memory_space<vmem>>, %arg6: memref<1x128xf32, #tpu.memory_space<vmem>>, %arg7: memref<1x1x64x128xf32, #tpu.memory_space<vmem>>) attributes {dimension_semantics = [#tpu.dimension_semantics<parallel>, #tpu.dimension_semantics<parallel>, #tpu.dimension_semantics<parallel>], iteration_bounds = array<i64: 1, 2, 7>, scalar_prefetch = 0 : i64, scratch_operands = 0 : i64, tpu.core_type = #tpu.core_type<tc>, window_params = [{transform_indices = @transform_0, window_bounds = array<i64: 1, 1, 80, 4>}, {transform_indices = @transform_1, window_bounds = array<i64: 1, 1, 80, 4>}, {transform_indices = @transform_2, window_bounds = array<i64: 8, 4, 128>}, {transform_indices = @transform_3, window_bounds = array<i64: 1, 128>}, {transform_indices = @transform_4, window_bounds = array<i64: 1, 1, 64, 128>}]} {
    %cst = arith.constant 0.000000e+00 : f32
    %0 = vector.broadcast %cst : f32 to vector<64x128xf32>
    %c0 = arith.constant 0 : index
    %c0_0 = arith.constant 0 : index
    %c0_1 = arith.constant 0 : index
    %c0_2 = arith.constant 0 : index
    %1 = vector.load %arg3[%c0, %c0_0, %c0_1, %c0_2] : memref<1x1x80x4xf32, #tpu.memory_space<vmem>>, vector<1x1x64x4xf32>
    %2 = vector.shape_cast %1 : vector<1x1x64x4xf32> to vector<64x4xf32>
    %c0_3 = arith.constant 0 : index
    %c0_4 = arith.constant 0 : index
    %c0_5 = arith.constant 0 : index
    %3 = vector.load %arg5[%c0_3, %c0_4, %c0_5] : memref<8x4x128xf32, #tpu.memory_space<vmem>>, vector<1x4x128xf32>
    %4 = vector.shape_cast %3 : vector<1x4x128xf32> to vector<4x128xf32>
    %cst_6 = arith.constant dense<0.000000e+00> : vector<64x128xf32>
    %5 = tpu.matmul %2, %4, %cst_6 {dimension_numbers = #tpu.dot_dimension_numbers<[1], [0], [0], [1], [0, 0, 1, 1], [], []>} : vector<64x4xf32>, vector<4x128xf32>, vector<64x128xf32> -> vector<64x128xf32>
    %6 = arith.addf %0, %5 : vector<64x128xf32>
    %c0_7 = arith.constant 0 : index
    %c0_8 = arith.constant 0 : index
    %c1 = arith.constant 1 : index
    %c0_9 = arith.constant 0 : index
    %7 = vector.load %arg3[%c0_7, %c0_8, %c1, %c0_9] : memref<1x1x80x4xf32, #tpu.memory_space<vmem>>, vector<1x1x64x4xf32>
    %8 = vector.shape_cast %7 : vector<1x1x64x4xf32> to vector<64x4xf32>
    %c1_10 = arith.constant 1 : index
    %c0_11 = arith.constant 0 : index
    %c0_12 = arith.constant 0 : index
    %9 = vector.load %arg5[%c1_10, %c0_11, %c0_12] : memref<8x4x128xf32, #tpu.memory_space<vmem>>, vector<1x4x128xf32>
    %10 = vector.shape_cast %9 : vector<1x4x128xf32> to vector<4x128xf32>
    %cst_13 = arith.constant dense<0.000000e+00> : vector<64x128xf32>
    %11 = tpu.matmul %8, %10, %cst_13 {dimension_numbers = #tpu.dot_dimension_numbers<[1], [0], [0], [1], [0, 0, 1, 1], [], []>} : vector<64x4xf32>, vector<4x128xf32>, vector<64x128xf32> -> vector<64x128xf32>
    %12 = arith.addf %6, %11 : vector<64x128xf32>
    %c0_14 = arith.constant 0 : index
    %c0_15 = arith.constant 0 : index
    %c8 = arith.constant 8 : index
    %c0_16 = arith.constant 0 : index
    %13 = vector.load %arg3[%c0_14, %c0_15, %c8, %c0_16] : memref<1x1x80x4xf32, #tpu.memory_space<vmem>>, vector<1x1x64x4xf32>
    %14 = vector.shape_cast %13 : vector<1x1x64x4xf32> to vector<64x4xf32>
    %c2 = arith.constant 2 : index
    %c0_17 = arith.constant 0 : index
    %c0_18 = arith.constant 0 : index
    %15 = vector.load %arg5[%c2, %c0_17, %c0_18] : memref<8x4x128xf32, #tpu.memory_space<vmem>>, vector<1x4x128xf32>
    %16 = vector.shape_cast %15 : vector<1x4x128xf32> to vector<4x128xf32>
    %cst_19 = arith.constant dense<0.000000e+00> : vector<64x128xf32>
    %17 = tpu.matmul %14, %16, %cst_19 {dimension_numbers = #tpu.dot_dimension_numbers<[1], [0], [0], [1], [0, 0, 1, 1], [], []>} : vector<64x4xf32>, vector<4x128xf32>, vector<64x128xf32> -> vector<64x128xf32>
    %18 = arith.addf %12, %17 : vector<64x128xf32>
    %c0_20 = arith.constant 0 : index
    %c0_21 = arith.constant 0 : index
    %c9 = arith.constant 9 : index
    %c0_22 = arith.constant 0 : index
    %19 = vector.load %arg3[%c0_20, %c0_21, %c9, %c0_22] : memref<1x1x80x4xf32, #tpu.memory_space<vmem>>, vector<1x1x64x4xf32>
    %20 = vector.shape_cast %19 : vector<1x1x64x4xf32> to vector<64x4xf32>
    %c3 = arith.constant 3 : index
    %c0_23 = arith.constant 0 : index
    %c0_24 = arith.constant 0 : index
    %21 = vector.load %arg5[%c3, %c0_23, %c0_24] : memref<8x4x128xf32, #tpu.memory_space<vmem>>, vector<1x4x128xf32>
    %22 = vector.shape_cast %21 : vector<1x4x128xf32> to vector<4x128xf32>
    %cst_25 = arith.constant dense<0.000000e+00> : vector<64x128xf32>
    %23 = tpu.matmul %20, %22, %cst_25 {dimension_numbers = #tpu.dot_dimension_numbers<[1], [0], [0], [1], [0, 0, 1, 1], [], []>} : vector<64x4xf32>, vector<4x128xf32>, vector<64x128xf32> -> vector<64x128xf32>
    %24 = arith.addf %18, %23 : vector<64x128xf32>
    %c0_26 = arith.constant 0 : index
    %c0_27 = arith.constant 0 : index
    %c0_28 = arith.constant 0 : index
    %c0_29 = arith.constant 0 : index
    %25 = vector.load %arg4[%c0_26, %c0_27, %c0_28, %c0_29] : memref<1x1x80x4xf32, #tpu.memory_space<vmem>>, vector<1x1x64x4xf32>
    %26 = vector.shape_cast %25 : vector<1x1x64x4xf32> to vector<64x4xf32>
    %c4 = arith.constant 4 : index
    %c0_30 = arith.constant 0 : index
    %c0_31 = arith.constant 0 : index
    %27 = vector.load %arg5[%c4, %c0_30, %c0_31] : memref<8x4x128xf32, #tpu.memory_space<vmem>>, vector<1x4x128xf32>
    %28 = vector.shape_cast %27 : vector<1x4x128xf32> to vector<4x128xf32>
    %cst_32 = arith.constant dense<0.000000e+00> : vector<64x128xf32>
    %29 = tpu.matmul %26, %28, %cst_32 {dimension_numbers = #tpu.dot_dimension_numbers<[1], [0], [0], [1], [0, 0, 1, 1], [], []>} : vector<64x4xf32>, vector<4x128xf32>, vector<64x128xf32> -> vector<64x128xf32>
    %30 = arith.addf %24, %29 : vector<64x128xf32>
    %c0_33 = arith.constant 0 : index
    %c0_34 = arith.constant 0 : index
    %c1_35 = arith.constant 1 : index
    %c0_36 = arith.constant 0 : index
    %31 = vector.load %arg4[%c0_33, %c0_34, %c1_35, %c0_36] : memref<1x1x80x4xf32, #tpu.memory_space<vmem>>, vector<1x1x64x4xf32>
    %32 = vector.shape_cast %31 : vector<1x1x64x4xf32> to vector<64x4xf32>
    %c5 = arith.constant 5 : index
    %c0_37 = arith.constant 0 : index
    %c0_38 = arith.constant 0 : index
    %33 = vector.load %arg5[%c5, %c0_37, %c0_38] : memref<8x4x128xf32, #tpu.memory_space<vmem>>, vector<1x4x128xf32>
    %34 = vector.shape_cast %33 : vector<1x4x128xf32> to vector<4x128xf32>
    %cst_39 = arith.constant dense<0.000000e+00> : vector<64x128xf32>
    %35 = tpu.matmul %32, %34, %cst_39 {dimension_numbers = #tpu.dot_dimension_numbers<[1], [0], [0], [1], [0, 0, 1, 1], [], []>} : vector<64x4xf32>, vector<4x128xf32>, vector<64x128xf32> -> vector<64x128xf32>
    %36 = arith.addf %30, %35 : vector<64x128xf32>
    %c0_40 = arith.constant 0 : index
    %c0_41 = arith.constant 0 : index
    %c8_42 = arith.constant 8 : index
    %c0_43 = arith.constant 0 : index
    %37 = vector.load %arg4[%c0_40, %c0_41, %c8_42, %c0_43] : memref<1x1x80x4xf32, #tpu.memory_space<vmem>>, vector<1x1x64x4xf32>
    %38 = vector.shape_cast %37 : vector<1x1x64x4xf32> to vector<64x4xf32>
    %c6 = arith.constant 6 : index
    %c0_44 = arith.constant 0 : index
    %c0_45 = arith.constant 0 : index
    %39 = vector.load %arg5[%c6, %c0_44, %c0_45] : memref<8x4x128xf32, #tpu.memory_space<vmem>>, vector<1x4x128xf32>
    %40 = vector.shape_cast %39 : vector<1x4x128xf32> to vector<4x128xf32>
    %cst_46 = arith.constant dense<0.000000e+00> : vector<64x128xf32>
    %41 = tpu.matmul %38, %40, %cst_46 {dimension_numbers = #tpu.dot_dimension_numbers<[1], [0], [0], [1], [0, 0, 1, 1], [], []>} : vector<64x4xf32>, vector<4x128xf32>, vector<64x128xf32> -> vector<64x128xf32>
    %42 = arith.addf %36, %41 : vector<64x128xf32>
    %c0_47 = arith.constant 0 : index
    %c0_48 = arith.constant 0 : index
    %c9_49 = arith.constant 9 : index
    %c0_50 = arith.constant 0 : index
    %43 = vector.load %arg4[%c0_47, %c0_48, %c9_49, %c0_50] : memref<1x1x80x4xf32, #tpu.memory_space<vmem>>, vector<1x1x64x4xf32>
    %44 = vector.shape_cast %43 : vector<1x1x64x4xf32> to vector<64x4xf32>
    %c7 = arith.constant 7 : index
    %c0_51 = arith.constant 0 : index
    %c0_52 = arith.constant 0 : index
    %45 = vector.load %arg5[%c7, %c0_51, %c0_52] : memref<8x4x128xf32, #tpu.memory_space<vmem>>, vector<1x4x128xf32>
    %46 = vector.shape_cast %45 : vector<1x4x128xf32> to vector<4x128xf32>
    %cst_53 = arith.constant dense<0.000000e+00> : vector<64x128xf32>
    %47 = tpu.matmul %44, %46, %cst_53 {dimension_numbers = #tpu.dot_dimension_numbers<[1], [0], [0], [1], [0, 0, 1, 1], [], []>} : vector<64x4xf32>, vector<4x128xf32>, vector<64x128xf32> -> vector<64x128xf32>
    %48 = arith.addf %42, %47 : vector<64x128xf32>
    %c0_54 = arith.constant 0 : index
    %c0_55 = arith.constant 0 : index
    %49 = vector.load %arg6[%c0_54, %c0_55] : memref<1x128xf32, #tpu.memory_space<vmem>>, vector<1x128xf32>
    %50 = vector.broadcast %49 : vector<1x128xf32> to vector<64x128xf32>
    %51 = arith.addf %48, %50 : vector<64x128xf32>
    %c0_56 = arith.constant 0 : index
    %c0_57 = arith.constant 0 : index
    %c0_58 = arith.constant 0 : index
    %c0_59 = arith.constant 0 : index
    %52 = vector.load %arg7[%c0_56, %c0_57, %c0_58, %c0_59] : memref<1x1x64x128xf32, #tpu.memory_space<vmem>>, vector<1x1x64x128xf32>
    %53 = vector.shape_cast %52 : vector<1x1x64x128xf32> to vector<64x128xf32>
    %54 = vector.shape_cast %51 : vector<64x128xf32> to vector<1x1x64x128xf32>
    tpu.vector_store %arg7[%c0_56, %c0_57, %c0_58, %c0_59], %54 {strides = array<i32>} : memref<1x1x64x128xf32, #tpu.memory_space<vmem>>, vector<1x1x64x128xf32>,
    return
  }
  func.func @transform_0(%arg0: i32, %arg1: i32, %arg2: i32) -> (i32, i32, i32, i32) {
    %c0_i32 = arith.constant 0 : i32
    %0 = arith.addi %arg2, %c0_i32 : i32
    %c0_i32_0 = arith.constant 0 : i32
    %c0_i32_1 = arith.constant 0 : i32
    %c0_i32_2 = arith.constant 0 : i32
    return %arg1, %0, %c0_i32_0, %c0_i32_1 : i32, i32, i32, i32
  }
  func.func @transform_1(%arg0: i32, %arg1: i32, %arg2: i32) -> (i32, i32, i32, i32) {
    %c1_i32 = arith.constant 1 : i32
    %0 = arith.addi %arg2, %c1_i32 : i32
    %c0_i32 = arith.constant 0 : i32
    %c0_i32_0 = arith.constant 0 : i32
    %c0_i32_1 = arith.constant 0 : i32
    return %arg1, %0, %c0_i32, %c0_i32_0 : i32, i32, i32, i32
  }
  func.func @transform_2(%arg0: i32, %arg1: i32, %arg2: i32) -> (i32, i32, i32) {
    %c0_i32 = arith.constant 0 : i32
    %c0_i32_0 = arith.constant 0 : i32
    %c0_i32_1 = arith.constant 0 : i32
    return %c0_i32, %c0_i32_0, %arg0 : i32, i32, i32
  }
  func.func @transform_3(%arg0: i32, %arg1: i32, %arg2: i32) -> (i32, i32) {
    %c0_i32 = arith.constant 0 : i32
    %c0_i32_0 = arith.constant 0 : i32
    return %c0_i32, %arg0 : i32, i32
  }
  func.func @transform_4(%arg0: i32, %arg1: i32, %arg2: i32) -> (i32, i32, i32, i32) {
    %c0_i32 = arith.constant 0 : i32
    %c0_i32_0 = arith.constant 0 : i32
    return %arg1, %arg2, %c0_i32, %arg0 : i32, i32, i32, i32
  }
}

</mosaic_0001>

<bundles_post_ra>
// kernel: tpu_custom_call.1
= control target key start
LH: loop header
LB: loop body
LE: loop exit
PB: predicated region body
PF: predicated region fallthrough
CT: control target
= control target key end

     0   :  { %9 = vsyncpa [#allocation3], 0  ;;  %s1785_s0 = inlined_call_operand.vmem [shape: f32[2,8,80,4], index: 0, kind: input, shape index: {}]   ;;  %s1786_s1 = inlined_call_operand.vmem [shape: f32[2,8,80,4], index: 1, kind: input, shape index: {}]   ;;  %s1787_s2 = inlined_call_operand.vmem [shape: f32[8,4,128], index: 2, kind: input, shape index: {}]   ;;  %s1788_s3 = inlined_call_operand.vmem [shape: f32[1,128], index: 3, kind: input, shape index: {}]   ;;  %s1789_s4 = inlined_call_operand.hbm [shape: f32[2,7,64,128], index: 4, kind: output, shape index: {}]  }
   0x1   :  { %11 = vsyncpa [#allocation3 + $0x1], 0  ;;  %s1449_s15 = smov 0   ;;  %s1451_s16 = smov 0  }
   0x2   :  { %s1453_s17 = smov 0   ;;  %s1455_s18 = smov 0  }
   0x3   :  { %s1457_s19 = smov 0   ;;  %s1459_s20 = smov 0  }
   0x4   :  { %s1461_s21 = smov 0   ;;  %s1463_s22 = smov 0  }
   0x5 LB: > { %s1154_s23 = sadd.s32 4294967295, %s1420_s22   ;;  %s1155_s24 = sadd.s32 4294967294, %s1420_s22   ;;  %s1420_s22 = sphi %s1463_s22, %s17_s22   ;;  %s1416_s21 = sphi %s1461_s21, %s1798_s21   ;;  %s1412_s20 = sphi %s1459_s20, %s1797_s20   ;;  %s1408_s19 = sphi %s1457_s19, %s1796_s19   ;;  %s1404_s18 = sphi %s1455_s18, %s1795_s18   ;;  %s1400_s17 = sphi %s1453_s17, %s1794_s17   ;;  %s1396_s16 = sphi %s1451_s16, %s1793_s16   ;;  %s1392_s15 = sphi %s1449_s15, %s1792_s15  }
   0x6   : > { %s29_s25 = sadd.s32 1, %s1412_s20  ;;  %s32_s26 = sadd.s32 1, %s1416_s21 }
   0x7   : > { %p30_p0 = scmp.ge.s32.totalorder %s29_s25, 7  ;;  %p167_p1 = scmp.ne.s32.totalorder %s1400_s17, %s1396_s16 }
   0x8   : > { %p168_p2 = scmp.eq.s32.totalorder %s1154_s23, 13  ;;  %p173_p5 = scmp.ne.s32.totalorder %s1396_s16, %s1392_s15 }
   0x9   : > { %s1800_s25 = smov (%p30_p0, %s29_s25), 0  ;;  %s1802_s26 = smov (!%p30_p0, %s32_s26), %s1416_s21 }
   0xa   : > { %s151_s27 = ssub.s32 %s1412_s20, %s1800_s25  ;;  %p1500_p3 = por %p168_p2, %p167_p1 }
   0xb   : > { %p34_p4 = scmp.ge.s32.totalorder %s1802_s26, 2  ;;  %p174_p6 = scmp.eq.s32.totalorder %s1155_s24, 13 }
   0xc   : > { %p1160_p7 = scmp.ge.s32.totalorder %s1420_s22, 1  ;;  %p231_p9 = scmp.lt.s32.totalorder %s1420_s22, 15 }
   0xd   : > { %s1804_s26 = smov (%p34_p4, %s1802_s26), 0  ;;  %p1509_p8 = por %p174_p6, %p173_p5 }
   0xe   : > { %s150_s30 = ssub.s32 %s1416_s21, %s1804_s26  ;;  %s157_s5 = sadd.s32 1, %s1400_s17 }
   0xf   : > { %s152_s6 = sor.u32 %s151_s27, %s150_s30  ;;  %p232_p10 = pnand %p1160_p7, %p231_p9 }
  0x10   : > { %p155_p11 = scmp.eq.s32.totalorder %s152_s6, 0  ;;  %p278_p12 = scmp.lt.s32.totalorder (!%p232_p10), %s1408_s19, 1 }
  0x11   : > { %235 = sbr.rel (%p232_p10) target bundleno = 295 (0x127), region = 36  ;;  %p280_p13 = scmp.lt.s32.totalorder (!%p232_p10), %s1404_s18, 7 }
  0x12   : > { %s1518_s7 = scalar_select %p155_p11, %s1400_s17, %s157_s5  }
  0x16   : > { %v1164_v0 = vld [vmem:[%s1787_s2 + $0x4] sm:$0xf]  ;;  %vm349_vm0 = vcmask 1043456   ;;  %v1183_v1 = vld [vmem:[%s1787_s2 + $0x8] sm:$0xf]  ;;  %s1537_s24 = scalar_select %p278_p12, %s1408_s19, 1 }
  0x17   : > { %1165 = vmatpush.msk.msra.mxu0 %vm349_vm0, %v1164_v0  ;;  %1184 = vmatpush.msk.msra.mxu2 %vm349_vm0, %v1183_v1  ;;  %v1223_v2 = vld [vmem:[%s1787_s2 + $0x18] sm:$0xf]  ;;  %v313_v3 = vld [vmem:[%s1787_s2] sm:$0xf]  ;;  %v1193_v4 = vld [vmem:[%s1787_s2 + $0xc] sm:$0xf] }
  0x18   : > { %1174 = vmatpush.msk.msra.mxu1 %vm349_vm0, %v313_v3  ;;  %v1203_v5 = vld [vmem:[%s1787_s2 + $0x10] sm:$0xf]  ;;  %s281_s8 = scalar_select %p280_p13, %s1404_s18, 7  ;;  %1194 = vmatpush.msk.msra.mxu3 %vm349_vm0, %v1193_v4  ;;  %v1233_v6 = vld [vmem:[%s1787_s2 + $0x1c] sm:$0xf]  ;;  %vm324_vm1 = vcmask 31744  }
  0x19   : > { %1224 = vmatpush.msk.msrb.mxu2 %vm349_vm0, %v1223_v2  ;;  %1204 = vmatpush.msk.msrb.mxu0 %vm349_vm0, %v1203_v5  ;;  %v1213_v7 = vld [vmem:[%s1787_s2 + $0x14] sm:$0xf]  ;;  %s1249_s13 = smul.u32 80, %s1537_s24  ;;  %s275_s24 = sand.u32 1, %s1396_s16  }
  0x1a   : > { %1234 = vmatpush.msk.msrb.mxu3 %vm349_vm0, %v1233_v6  ;;  %1214 = vmatpush.msk.msrb.mxu1 %vm349_vm0, %v1213_v7  ;;  %s1248_s14 = smul.u32 10, %s281_s8  ;;  %s287_s8 = sadd.s32 1, %s1404_s18 }
  0x1b   : > { %p290_p0 = scmp.lt.s32.totalorder %s287_s8, 7 }
  0x1c   : > { %s284_s23 = sadd.s32 %s1249_s13, %s1248_s14 }
  0x1d   : > { %s1162_s27 = sshll.u32 %s284_s23, 3  ;;  %s1806_s8 = smov (!%p290_p0, %s287_s8), 7 }
  0x1e   : > { %s1564_s6 = scalar_lea.vmem %s1785_s0, %s1162_s27  ;;  %s1250_s9 = smul.u32 10, %s1806_s8 }
  0x1f   : > { %v314_v8 = vld [vmem:[%s1564_s6 + $0x1] sm:$0xff]  ;;  %v548_v11 = vld [vmem:[%s1564_s6 + $0x9] sm:$0xff]  ;;  %v549_v13 = vld [vmem:[%s1564_s6 + $0x11] sm:$0xff]  ;;  %s1244_s8 = sshll.u32 %s1404_s18, 3 }
  0x20   : > { %v462_v9 = vld [vmem:[%s1564_s6 + $0x8] sm:$0xff]  ;;  %v305_v10 = vld [vmem:[%s1564_s6] sm:$0xff]  ;;  %1166 = vmatmul.msk.f32.vlgmr.msra.gmra.mxu0 %vm324_vm1, %v314_v8  ;;  %1195 = vmatmul.msk.f32.vlgmr.msra.gmra.mxu3 %vm324_vm1, %v548_v11  ;;  %v463_v12 = vld [vmem:[%s1564_s6 + $0x10] sm:$0xff]  ;;  %s294_s10 = sadd.s32 %s1250_s9, %s1249_s13  ;;  %s1161_s13 = sshll.u32 %s275_s24, 6 }
  0x21   : > { %1185 = vmatmul.msk.f32.vlgmr.msra.gmra.mxu2 %vm324_vm1, %v462_v9  ;;  %1175 = vmatmul.msk.f32.vlgmr.msra.gmra.mxu1 %vm324_vm1, %v305_v10  ;;  %v464_v14 = vld [vmem:[%s1564_s6 + $0x18] sm:$0xff]  ;;  %v465_v16 = vld [vmem:[%s1564_s6 + $0x20] sm:$0xff]  ;;  %v466_v18 = vld [vmem:[%s1564_s6 + $0x28] sm:$0xff]  ;;  %s1163_s11 = sshll.u32 %s294_s10, 3  ;;  %s1709_s5 = scalar_lea.vmem [#allocation2], %s1161_s13 }
  0x22   : > { %v550_v15 = vld [vmem:[%s1564_s6 + $0x19] sm:$0xff]  ;;  %v551_v17 = vld [vmem:[%s1564_s6 + $0x21] sm:$0xff]  ;;  %v552_v19 = vld [vmem:[%s1564_s6 + $0x29] sm:$0xff]  ;;  %s1622_s23 = scalar_lea.vmem %s1786_s1, %s1163_s11  ;;  %s1014_s12 = sshll.u32 %s1709_s5, 4  ;;  %s1015_s12 = int_to_ptr.vmem [resolvable:$true] %s1014_s12 }
  0x23   : > { %v467_v20 = vld [vmem:[%s1564_s6 + $0x30] sm:$0xff]  ;;  %v468_v22 = vld [vmem:[%s1564_s6 + $0x38] sm:$0xff]  ;;  %v469_v24 = vld [vmem:[%s1564_s6 + $0x40] sm:$0xff] }
  0x24   : > { %v553_v21 = vld [vmem:[%s1564_s6 + $0x31] sm:$0xff]  ;;  %v554_v23 = vld [vmem:[%s1564_s6 + $0x39] sm:$0xff]  ;;  %v555_v25 = vld [vmem:[%s1564_s6 + $0x41] sm:$0xff]  ;;  %s1251_s6 = smul.u32 56, %s1408_s19 }
  0x25   : > { %v634_v26 = vld [vmem:[%s1622_s23] sm:$0xff]  ;;  %v806_v27 = vld [vmem:[%s1622_s23 + $0x8] sm:$0xff]  ;;  %v807_v30 = vld [vmem:[%s1622_s23 + $0x10] sm:$0xff] }
  0x26   : > { %v720_v28 = vld [vmem:[%s1622_s23 + $0x1] sm:$0xff]  ;;  %v892_v29 = vld [vmem:[%s1622_s23 + $0x9] sm:$0xff]  ;;  %v893_v31 = vld [vmem:[%s1622_s23 + $0x11] sm:$0xff]  ;;  %s1011_s9 = sadd.s32 %s1251_s6, %s1244_s8  ;;  %s1346_s8 = scalar_lea.hbm %s1789_s4, 896 }
  0x27   : > { %v808_v32 = vld [vmem:[%s1622_s23 + $0x18] sm:$0xff]  ;;  %v809_v34 = vld [vmem:[%s1622_s23 + $0x20] sm:$0xff]  ;;  %v810_v36 = vld [vmem:[%s1622_s23 + $0x28] sm:$0xff]  ;;  %s1245_s19 = sshll.u32 %s1011_s9, 3 }
  0x28   : > { %1167 = vmatmul.msk.f32.gmra.mxu0 %vm324_vm1, %v548_v11  ;;  %1196 = vmatmul.msk.f32.gmra.mxu3 %vm324_vm1, %v549_v13  ;;  %v894_v33 = vld [vmem:[%s1622_s23 + $0x19] sm:$0xff]  ;;  %v895_v35 = vld [vmem:[%s1622_s23 + $0x21] sm:$0xff]  ;;  %v896_v37 = vld [vmem:[%s1622_s23 + $0x29] sm:$0xff]  ;;  %s1013_s11 = scalar_lea.hbm %s1789_s4, %s1245_s19 }
  0x29   : > { %1186 = vmatmul.msk.f32.gmra.mxu2 %vm324_vm1, %v463_v12  ;;  %1176 = vmatmul.msk.f32.gmra.mxu1 %vm324_vm1, %v462_v9  ;;  %v811_v38 = vld [vmem:[%s1622_s23 + $0x30] sm:$0xff]  ;;  %v812_v40 = vld [vmem:[%s1622_s23 + $0x38] sm:$0xff]  ;;  %v813_v42 = vld [vmem:[%s1622_s23 + $0x40] sm:$0xff]  ;;  %s1016_s14 = sshll.u32 %s1013_s11, 4  ;;  %s1017_s14 = int_to_ptr.hbm [resolvable:$true] %s1016_s14 }
  0x2a   : > { %v897_v39 = vld [vmem:[%s1622_s23 + $0x31] sm:$0xff]  ;;  %v898_v41 = vld [vmem:[%s1622_s23 + $0x39] sm:$0xff]  ;;  %v899_v43 = vld [vmem:[%s1622_s23 + $0x41] sm:$0xff]  ;;  %s999_s23 = scalar_lea.sflag [#allocation3], %s275_s24  ;;  %s1340_s13 = sshra.s32 %s1017_s14, 4  ;;  %s1341_s13 = int_to_ptr.hbm [resolvable:$true] %s1340_s13 }
  0x2b   : > { %s1342_s27 = scalar_lea.hbm %s1341_s13, 64  ;;  %p1347_p5 = scmp.lt.s32.totalorder %s1341_s13, %s1789_s4 }
  0x2c   : > { %p1343_p1 = scmp.ne.s32.totalorder %s1341_s13, %s1342_s27  ;;  %p1348_p6 = scmp.lt.s32.totalorder %s1346_s8, %s1342_s27 }
  0x2e   : > { %p1344_p2 = pnand %p1343_p1, %p1500_p3  ;;  %p1349_p7 = por %p1348_p6, %p1347_p5 }
  0x30   : > { %1168 = vmatmul.msk.f32.gmra.mxu0 %vm324_vm1, %v549_v13  ;;  %1197 = vmatmul.msk.f32.gmra.mxu3 %vm324_vm1, %v550_v15  ;;  %p1345_p4 = pneg %p1344_p2 }
  0x31   : > { %1187 = vmatmul.msk.f32.gmra.mxu2 %vm324_vm1, %v464_v14  ;;  %1177 = vmatmul.msk.f32.gmra.mxu1 %vm324_vm1, %v463_v12 }
  0x32   : > { %p1350_p9 = pnand %p1349_p7, %p1345_p4 }
  0x38   : > { %1169 = vmatmul.msk.f32.gmra.mxu0 %vm324_vm1, %v550_v15  ;;  %1198 = vmatmul.msk.f32.gmra.mxu3 %vm324_vm1, %v551_v17 }
  0x39   : > { %1188 = vmatmul.msk.f32.gmra.mxu2 %vm324_vm1, %v465_v16  ;;  %1178 = vmatmul.msk.f32.gmra.mxu1 %vm324_vm1, %v464_v14 }
  0x40   : > { %1170 = vmatmul.msk.f32.gmra.mxu0 %vm324_vm1, %v551_v17  ;;  %1199 = vmatmul.msk.f32.gmra.mxu3 %vm324_vm1, %v552_v19 }
  0x41   : > { %1189 = vmatmul.msk.f32.gmra.mxu2 %vm324_vm1, %v466_v18  ;;  %1179 = vmatmul.msk.f32.gmra.mxu1 %vm324_vm1, %v465_v16 }
  0x48   : > { %1171 = vmatmul.msk.f32.gmra.mxu0 %vm324_vm1, %v552_v19  ;;  %1200 = vmatmul.msk.f32.gmra.mxu3 %vm324_vm1, %v553_v21 }
  0x49   : > { %1190 = vmatmul.msk.f32.gmra.mxu2 %vm324_vm1, %v467_v20  ;;  %1180 = vmatmul.msk.f32.gmra.mxu1 %vm324_vm1, %v466_v18 }
  0x50   : > { %1172 = vmatmul.msk.f32.gmra.mxu0 %vm324_vm1, %v553_v21  ;;  %1201 = vmatmul.msk.f32.gmra.mxu3 %vm324_vm1, %v554_v23 }
  0x51   : > { %1191 = vmatmul.msk.f32.gmra.mxu2 %vm324_vm1, %v468_v22  ;;  %1181 = vmatmul.msk.f32.gmra.mxu1 %vm324_vm1, %v467_v20 }
  0x58   : > { %1173 = vmatmul.msk.f32.gmra.mxu0 %vm324_vm1, %v554_v23  ;;  %1202 = vmatmul.msk.f32.gmra.mxu3 %vm324_vm1, %v555_v25  ;;  %v1706_v25 = vld [vmem:[%s1788_s3] ss:$0 sm:$0xff] }
  0x59   : > { %1192 = vmatmul.msk.f32.gmra.mxu2 %vm324_vm1, %v469_v24  ;;  %1182 = vmatmul.msk.f32.gmra.mxu1 %vm324_vm1, %v468_v22 }
  0x60   : > { %1205 = vmatmul.msk.f32.vlgmr.msrb.gmra.mxu0 %vm324_vm1, %v634_v26  ;;  %1235 = vmatmul.msk.f32.vlgmr.msrb.gmra.mxu3 %vm324_vm1, %v892_v29 }
  0x61   : > { %1225 = vmatmul.msk.f32.vlgmr.msrb.gmra.mxu2 %vm324_vm1, %v806_v27  ;;  %1215 = vmatmul.msk.f32.vlgmr.msrb.gmra.mxu1 %vm324_vm1, %v720_v28 }
  0x68   : > { %1206 = vmatmul.msk.f32.gmra.mxu0 %vm324_vm1, %v806_v27  ;;  %1236 = vmatmul.msk.f32.gmra.mxu3 %vm324_vm1, %v893_v31 }
  0x69   : > { %1226 = vmatmul.msk.f32.gmra.mxu2 %vm324_vm1, %v807_v30  ;;  %1216 = vmatmul.msk.f32.gmra.mxu1 %vm324_vm1, %v892_v29 }
  0x70   : > { %1207 = vmatmul.msk.f32.gmra.mxu0 %vm324_vm1, %v807_v30  ;;  %1237 = vmatmul.msk.f32.gmra.mxu3 %vm324_vm1, %v894_v33 }
  0x71   : > { %1227 = vmatmul.msk.f32.gmra.mxu2 %vm324_vm1, %v808_v32  ;;  %1217 = vmatmul.msk.f32.gmra.mxu1 %vm324_vm1, %v893_v31 }
  0x78   : > { %1208 = vmatmul.msk.f32.gmra.mxu0 %vm324_vm1, %v808_v32  ;;  %1238 = vmatmul.msk.f32.gmra.mxu3 %vm324_vm1, %v895_v35 }
  0x79   : > { %1228 = vmatmul.msk.f32.gmra.mxu2 %vm324_vm1, %v809_v34  ;;  %1218 = vmatmul.msk.f32.gmra.mxu1 %vm324_vm1, %v894_v33 }
  0x80   : > { %1209 = vmatmul.msk.f32.gmra.mxu0 %vm324_vm1, %v809_v34  ;;  %1239 = vmatmul.msk.f32.gmra.mxu3 %vm324_vm1, %v896_v37 }
  0x81   : > { %1229 = vmatmul.msk.f32.gmra.mxu2 %vm324_vm1, %v810_v36  ;;  %1219 = vmatmul.msk.f32.gmra.mxu1 %vm324_vm1, %v895_v35 }
  0x88   : > { %1210 = vmatmul.msk.f32.gmra.mxu0 %vm324_vm1, %v810_v36  ;;  %1240 = vmatmul.msk.f32.gmra.mxu3 %vm324_vm1, %v897_v39 }
  0x89   : > { %1230 = vmatmul.msk.f32.gmra.mxu2 %vm324_vm1, %v811_v38  ;;  %1220 = vmatmul.msk.f32.gmra.mxu1 %vm324_vm1, %v896_v37 }
  0x90   : > { %1211 = vmatmul.msk.f32.gmra.mxu0 %vm324_vm1, %v811_v38  ;;  %1241 = vmatmul.msk.f32.gmra.mxu3 %vm324_vm1, %v898_v41 }
  0x91   : > { %1231 = vmatmul.msk.f32.gmra.mxu2 %vm324_vm1, %v812_v40  ;;  %1221 = vmatmul.msk.f32.gmra.mxu1 %vm324_vm1, %v897_v39 }
  0x98   : > { %1212 = vmatmul.msk.f32.gmra.mxu0 %vm324_vm1, %v812_v40  ;;  %1242 = vmatmul.msk.f32.gmra.mxu3 %vm324_vm1, %v899_v43 }
  0x99   : > { %1232 = vmatmul.msk.f32.gmra.mxu2 %vm324_vm1, %v813_v42  ;;  %1222 = vmatmul.msk.f32.gmra.mxu1 %vm324_vm1, %v898_v41 }
  0x9d   : > { %v370_v44 = vpop.f32.mrf.mxu0 }
  0x9e   : > { %v438_v45 = vpop.f32.mrf.mxu1 }
  0x9f   : > { %v439_v9 = vadd.f32 %v438_v45, %v370_v44 }
  0xa3   : > { %v602_v47 = vpop.f32.mrf.mxu3 }
  0xa4   : > { %v516_v46 = vpop.f32.mrf.mxu2 }
  0xa5   : > { %v373_v48 = vpop.f32.mrf.mxu0  ;;  %v540_v11 = vadd.f32 %v516_v46, %v439_v9 }
  0xa6   : > { %v441_v49 = vpop.f32.mrf.mxu1 }
  0xa7   : > { %v626_v13 = vadd.f32 %v602_v47, %v540_v11  ;;  %v442_v16 = vadd.f32 %v441_v49, %v373_v48 }
  0xab   : > { %v605_v51 = vpop.f32.mrf.mxu3 }
  0xac   : > { %v519_v50 = vpop.f32.mrf.mxu2 }
  0xad   : > { %v376_v52 = vpop.f32.mrf.mxu0  ;;  %v541_v19 = vadd.f32 %v519_v50, %v442_v16 }
  0xae   : > { %v444_v53 = vpop.f32.mrf.mxu1 }
  0xaf   : > { %v627_v22 = vadd.f32 %v605_v51, %v541_v19  ;;  %v445_v27 = vadd.f32 %v444_v53, %v376_v52 }
  0xb3   : > { %v608_v55 = vpop.f32.mrf.mxu3 }
  0xb4   : > { %v522_v54 = vpop.f32.mrf.mxu2 }
  0xb5   : > { %v379_v56 = vpop.f32.mrf.mxu0  ;;  %v542_v31 = vadd.f32 %v522_v54, %v445_v27 }
  0xb6   : > { %v447_v57 = vpop.f32.mrf.mxu1 }
  0xb7   : > { %v628_v35 = vadd.f32 %v608_v55, %v542_v31  ;;  %v448_v39 = vadd.f32 %v447_v57, %v379_v56 }
  0xbb   : > { %v611_v59 = vpop.f32.mrf.mxu3 }
  0xbc   : > { %v525_v58 = vpop.f32.mrf.mxu2 }
  0xbd   : > { %v382_v60 = vpop.f32.mrf.mxu0  ;;  %v543_v43 = vadd.f32 %v525_v58, %v448_v39 }
  0xbe   : > { %v450_v61 = vpop.f32.mrf.mxu1 }
  0xbf   : > { %v629_v47 = vadd.f32 %v611_v59, %v543_v43  ;;  %v451_v51 = vadd.f32 %v450_v61, %v382_v60 }
  0xc3   : > { %v1674_v63 = vpop.f32.mrf.mxu3 }
  0xc4   : > { %v528_v62 = vpop.f32.mrf.mxu2 }
  0xc5   : > { %v1676_v0 = vpop.f32.mrf.mxu0  ;;  %v544_v55 = vadd.f32 %v528_v62, %v451_v51 }
  0xc6   : > { %v1678_v1 = vpop.f32.mrf.mxu1 }
  0xc7   : > { %v630_v9 = vadd.f32 %v1674_v63, %v544_v55  ;;  %v454_v59 = vadd.f32 %v1678_v1, %v1676_v0 }
  0xcb   : > { %v1682_v3 = vpop.f32.mrf.mxu3 }
  0xcc   : > { %v1680_v2 = vpop.f32.mrf.mxu2 }
  0xcd   : > { %v1684_v4 = vpop.f32.mrf.mxu0 }
  0xce   : > { %v1686_v5 = vpop.f32.mrf.mxu1 }
  0xd3   : > { %v1690_v7 = vpop.f32.mrf.mxu3 }
  0xd4   : > { %v1688_v6 = vpop.f32.mrf.mxu2 }
  0xd5   : > { %v1692_v8 = vpop.f32.mrf.mxu0 }
  0xd6   : > { %v1694_v10 = vpop.f32.mrf.mxu1 }
  0xdb   : > { %v1698_v14 = vpop.f32.mrf.mxu3 }
  0xdc   : > { %v1696_v12 = vpop.f32.mrf.mxu2 }
  0xdd   : > { %v688_v15 = vpop.f32.mrf.mxu0 }
  0xde   : > { %v712_v17 = vadd.f32 %v688_v15, %v626_v13  ;;  %v774_v18 = vpop.f32.mrf.mxu1 }
  0xe0   : > { %v798_v20 = vadd.f32 %v774_v18, %v712_v17  ;;  %v545_v17 = vadd.f32 %v1680_v2, %v454_v59 }
  0xe3   : > { %v946_v24 = vpop.f32.mrf.mxu3 }
  0xe4   : > { %v860_v21 = vpop.f32.mrf.mxu2 }
  0xe5   : > { %v884_v23 = vadd.f32 %v860_v21, %v798_v20  ;;  %v691_v26 = vpop.f32.mrf.mxu0  ;;  %v631_v20 = vadd.f32 %v1682_v3, %v545_v17 }
  0xe6   : > { %v713_v28 = vadd.f32 %v691_v26, %v627_v22  ;;  %v777_v30 = vpop.f32.mrf.mxu1 }
  0xe7   : > { %v970_v29 = vadd.f32 %v946_v24, %v884_v23  ;;  %v457_v23 = vadd.f32 %v1686_v5, %v1684_v4  ;;  %v460_v4 = vadd.f32 %v1694_v10, %v1692_v8 }
  0xe8   : > { %v799_v33 = vadd.f32 %v777_v30, %v713_v28 }
  0xe9   : > { %v982_v32 = vadd.f32 %v1706_v25, %v970_v29  ;;  %v546_v26 = vadd.f32 %v1688_v6, %v457_v23  ;;  %v547_v6 = vadd.f32 %v1696_v12, %v460_v4 }
  0xeb   : > { %990 = vst [vmem:[%s1709_s5] sm:$0xff] %v982_v32  ;;  %v949_v37 = vpop.f32.mrf.mxu3  ;;  %v632_v3 = vadd.f32 %v1690_v7, %v546_v26  ;;  %v633_v7 = vadd.f32 %v1698_v14, %v547_v6 }
  0xec   : > { %v863_v34 = vpop.f32.mrf.mxu2 }
  0xed   : > { %v885_v36 = vadd.f32 %v863_v34, %v799_v33  ;;  %v694_v38 = vpop.f32.mrf.mxu0 }
  0xee   : > { %v714_v40 = vadd.f32 %v694_v38, %v628_v35  ;;  %v780_v42 = vpop.f32.mrf.mxu1 }
  0xef   : > { %v971_v41 = vadd.f32 %v949_v37, %v885_v36 }
  0xf0   : > { %v800_v45 = vadd.f32 %v780_v42, %v714_v40 }
  0xf1   : > { %v983_v44 = vadd.f32 %v1706_v25, %v971_v41 }
  0xf3   : > { %991 = vst [vmem:[%s1709_s5 + $0x8] sm:$0xff] %v983_v44  ;;  %v952_v49 = vpop.f32.mrf.mxu3 }
  0xf4   : > { %v866_v46 = vpop.f32.mrf.mxu2 }
  0xf5   : > { %v886_v48 = vadd.f32 %v866_v46, %v800_v45  ;;  %v697_v50 = vpop.f32.mrf.mxu0 }
  0xf6   : > { %v715_v52 = vadd.f32 %v697_v50, %v629_v47  ;;  %v783_v54 = vpop.f32.mrf.mxu1 }
  0xf7   : > { %v972_v53 = vadd.f32 %v952_v49, %v886_v48 }
  0xf8   : > { %v801_v57 = vadd.f32 %v783_v54, %v715_v52 }
  0xf9   : > { %v984_v56 = vadd.f32 %v1706_v25, %v972_v53 }
  0xfb   : > { %992 = vst [vmem:[%s1709_s5 + $0x10] sm:$0xff] %v984_v56  ;;  %v955_v13 = vpop.f32.mrf.mxu3 }
  0xfc   : > { %v869_v58 = vpop.f32.mrf.mxu2 }
  0xfd   : > { %v887_v11 = vadd.f32 %v869_v58, %v801_v57  ;;  %v700_v15 = vpop.f32.mrf.mxu0 }
  0xfe   : > { %v716_v16 = vadd.f32 %v700_v15, %v630_v9  ;;  %v786_v61 = vpop.f32.mrf.mxu1 }
  0xff   : > { %v973_v60 = vadd.f32 %v955_v13, %v887_v11 }
 0x100   : > { %v802_v18 = vadd.f32 %v786_v61, %v716_v16 }
 0x101   : > { %v985_v62 = vadd.f32 %v1706_v25, %v973_v60 }
 0x103   : > { %993 = vst [vmem:[%s1709_s5 + $0x18] sm:$0xff] %v985_v62  ;;  %v958_v21 = vpop.f32.mrf.mxu3 }
 0x104   : > { %v872_v19 = vpop.f32.mrf.mxu2 }
 0x105   : > { %v888_v63 = vadd.f32 %v872_v19, %v802_v18  ;;  %v703_v22 = vpop.f32.mrf.mxu0 }
 0x106   : > { %v717_v0 = vadd.f32 %v703_v22, %v631_v20  ;;  %v789_v24 = vpop.f32.mrf.mxu1 }
 0x107   : > { %v974_v1 = vadd.f32 %v958_v21, %v888_v63 }
 0x108   : > { %v803_v27 = vadd.f32 %v789_v24, %v717_v0 }
 0x109   : > { %v986_v2 = vadd.f32 %v1706_v25, %v974_v1 }
 0x10b   : > { %994 = vst [vmem:[%s1709_s5 + $0x20] sm:$0xff] %v986_v2  ;;  %v961_v30 = vpop.f32.mrf.mxu3 }
 0x10c   : > { %v875_v28 = vpop.f32.mrf.mxu2 }
 0x10d   : > { %v889_v29 = vadd.f32 %v875_v28, %v803_v27  ;;  %v706_v31 = vpop.f32.mrf.mxu0 }
 0x10e   : > { %v718_v5 = vadd.f32 %v706_v31, %v632_v3  ;;  %v792_v33 = vpop.f32.mrf.mxu1 }
 0x10f   : > { %v975_v32 = vadd.f32 %v961_v30, %v889_v29 }
 0x110   : > { %v804_v35 = vadd.f32 %v792_v33, %v718_v5 }
 0x111   : > { %v987_v34 = vadd.f32 %v1706_v25, %v975_v32 }
 0x113   : > { %995 = vst [vmem:[%s1709_s5 + $0x28] sm:$0xff] %v987_v34  ;;  %v964_v38 = vpop.f32.mrf.mxu3 }
 0x114   : > { %v878_v36 = vpop.f32.mrf.mxu2 }
 0x115   : > { %v890_v37 = vadd.f32 %v878_v36, %v804_v35  ;;  %v709_v8 = vpop.f32.mrf.mxu0 }
 0x116   : > { %v719_v10 = vadd.f32 %v709_v8, %v633_v7  ;;  %v795_v12 = vpop.f32.mrf.mxu1 }
 0x117   : > { %v976_v39 = vadd.f32 %v964_v38, %v890_v37 }
 0x118   : > { %v805_v41 = vadd.f32 %v795_v12, %v719_v10 }
 0x119   : > { %v988_v40 = vadd.f32 %v1706_v25, %v976_v39 }
 0x11b   : > { %996 = vst [vmem:[%s1709_s5 + $0x30] sm:$0xff] %v988_v40  ;;  %v967_v43 = vpop.f32.mrf.mxu3 }
 0x11c   : > { %v881_v42 = vpop.f32.mrf.mxu2 }
 0x11d   : > { %v891_v14 = vadd.f32 %v881_v42, %v805_v41 }
 0x11f   : > { %v977_v44 = vadd.f32 %v967_v43, %v891_v14 }
 0x121   : > { %v989_v45 = vadd.f32 %v1706_v25, %v977_v44 }
 0x123   : > { %997 = vst [vmem:[%s1709_s5 + $0x38] sm:$0xff] %v989_v45 }
 0x124   : > { %1353 = shalt.err (!%p1350_p9)
}
 0x125   : > { %s1422_s24 = smov 128   ;;  %s1423_s5 = smov 8  }
 0x126   : > { %1252 = dma.vmem_to_hbm [thread:$0]  (%p1500_p3), %s1015_s12, 1024, %s1017_s14, %s999_s23, %s1422_s24, %s1422_s24, %s1423_s5  }
 0x127 PF: > { %p1258_p10 = scmp.ge.s32.totalorder %s1420_s22, 2  ;;  %s1031_s10 = sand.u32 1, %s1392_s15  }
 0x128   : > { %s1032_s18 = scalar_lea.sflag [#allocation3], %s1031_s10 }
 0x129   : > { %p1255_p11 = pnand %p1258_p10, %p1509_p8 }
 0x12b   : > { %p1256_p12 = pneg %p1255_p11 }
 0x12d   : > { %1387 = dma.done.wait (%p1256_p12), %s1032_s18, 1024  }
 0x12e   : > { %1389 = vsyncadd (%p1256_p12), %s1032_s18, 4294966272  ;;  %s17_s22 = sadd.s32 1, %s1420_s22   ;;  %s1792_s15 = smov %s1396_s16 }
 0x12f   : > { %p14_p13 = scmp.ge.s32.totalorder %s17_s22, 16   ;;  %s1793_s16 = smov %s1400_s17 }
 0x130   : > { %s1794_s17 = smov %s1518_s7  ;;  %s1795_s18 = smov %s1412_s20 }
 0x131   : > { %s1796_s19 = smov %s1416_s21  ;;  %s1797_s20 = smov %s1800_s25 }
 0x132   : > { %s1798_s21 = smov %s1804_s26  ;;  %16 = sbr.rel (!%p14_p13) target bundleno = 5 (0x5), region = 87 }
 0x137   :  { %1038 = vsyncpa [#allocation3], 1 }
 0x138   :  { %1040 = vsyncpa [#allocation3 + $0x1], 1 }

// kernel: tpu_custom_call.1
= control target key start
LH: loop header
LB: loop body
LE: loop exit
PB: predicated region body
PF: predicated region fallthrough
CT: control target
= control target key end

     0   :  { %9 = vsyncpa [#allocation3], 0  ;;  %s1785_s0 = inlined_call_operand.vmem [shape: f32[2,8,80,4], index: 0, kind: input, shape index: {}]   ;;  %s1786_s1 = inlined_call_operand.vmem [shape: f32[2,8,80,4], index: 1, kind: input, shape index: {}]   ;;  %s1787_s2 = inlined_call_operand.vmem [shape: f32[8,4,128], index: 2, kind: input, shape index: {}]   ;;  %s1788_s3 = inlined_call_operand.vmem [shape: f32[1,128], index: 3, kind: input, shape index: {}]   ;;  %s1789_s4 = inlined_call_operand.hbm [shape: f32[2,7,64,128], index: 4, kind: output, shape index: {}]  }
   0x1   :  { %11 = vsyncpa [#allocation3 + $0x1], 0  ;;  %s1449_s15 = smov 0   ;;  %s1451_s16 = smov 0  }
   0x2   :  { %s1453_s17 = smov 0   ;;  %s1455_s18 = smov 0  }
   0x3   :  { %s1457_s19 = smov 0   ;;  %s1459_s20 = smov 0  }
   0x4   :  { %s1461_s21 = smov 0   ;;  %s1463_s22 = smov 0  }
   0x5 LB: > { %s1154_s23 = sadd.s32 4294967295, %s1420_s22   ;;  %s1155_s24 = sadd.s32 4294967294, %s1420_s22   ;;  %s1420_s22 = sphi %s1463_s22, %s17_s22   ;;  %s1416_s21 = sphi %s1461_s21, %s1798_s21   ;;  %s1412_s20 = sphi %s1459_s20, %s1797_s20   ;;  %s1408_s19 = sphi %s1457_s19, %s1796_s19   ;;  %s1404_s18 = sphi %s1455_s18, %s1795_s18   ;;  %s1400_s17 = sphi %s1453_s17, %s1794_s17   ;;  %s1396_s16 = sphi %s1451_s16, %s1793_s16   ;;  %s1392_s15 = sphi %s1449_s15, %s1792_s15  }
   0x6   : > { %s29_s25 = sadd.s32 1, %s1412_s20  ;;  %s32_s26 = sadd.s32 1, %s1416_s21 }
   0x7   : > { %p30_p0 = scmp.ge.s32.totalorder %s29_s25, 7  ;;  %p167_p1 = scmp.ne.s32.totalorder %s1400_s17, %s1396_s16 }
   0x8   : > { %p168_p2 = scmp.eq.s32.totalorder %s1154_s23, 13  ;;  %p173_p5 = scmp.ne.s32.totalorder %s1396_s16, %s1392_s15 }
   0x9   : > { %s1800_s25 = smov (%p30_p0, %s29_s25), 0  ;;  %s1802_s26 = smov (!%p30_p0, %s32_s26), %s1416_s21 }
   0xa   : > { %s151_s27 = ssub.s32 %s1412_s20, %s1800_s25  ;;  %p1500_p3 = por %p168_p2, %p167_p1 }
   0xb   : > { %p34_p4 = scmp.ge.s32.totalorder %s1802_s26, 2  ;;  %p174_p6 = scmp.eq.s32.totalorder %s1155_s24, 13 }
   0xc   : > { %p1160_p7 = scmp.ge.s32.totalorder %s1420_s22, 1  ;;  %p231_p9 = scmp.lt.s32.totalorder %s1420_s22, 15 }
   0xd   : > { %s1804_s26 = smov (%p34_p4, %s1802_s26), 0  ;;  %p1509_p8 = por %p174_p6, %p173_p5 }
   0xe   : > { %s150_s30 = ssub.s32 %s1416_s21, %s1804_s26  ;;  %s157_s5 = sadd.s32 1, %s1400_s17 }
   0xf   : > { %s152_s6 = sor.u32 %s151_s27, %s150_s30  ;;  %p232_p10 = pnand %p1160_p7, %p231_p9 }
  0x10   : > { %p155_p11 = scmp.eq.s32.totalorder %s152_s6, 0  ;;  %p278_p12 = scmp.lt.s32.totalorder (!%p232_p10), %s1408_s19, 1 }
  0x11   : > { %235 = sbr.rel (%p232_p10) target bundleno = 295 (0x127), region = 36  ;;  %p280_p13 = scmp.lt.s32.totalorder (!%p232_p10), %s1404_s18, 7 }
  0x12   : > { %s1518_s7 = scalar_select %p155_p11, %s1400_s17, %s157_s5  }
  0x16   : > { %v1164_v0 = vld [vmem:[%s1787_s2 + $0x4] sm:$0xf]  ;;  %vm349_vm0 = vcmask 1043456   ;;  %v1183_v1 = vld [vmem:[%s1787_s2 + $0x8] sm:$0xf]  ;;  %s1537_s24 = scalar_select %p278_p12, %s1408_s19, 1 }
  0x17   : > { %1165 = vmatpush.msk.msra.mxu0 %vm349_vm0, %v1164_v0  ;;  %1184 = vmatpush.msk.msra.mxu2 %vm349_vm0, %v1183_v1  ;;  %v1223_v2 = vld [vmem:[%s1787_s2 + $0x18] sm:$0xf]  ;;  %v313_v3 = vld [vmem:[%s1787_s2] sm:$0xf]  ;;  %v1193_v4 = vld [vmem:[%s1787_s2 + $0xc] sm:$0xf] }
  0x18   : > { %1174 = vmatpush.msk.msra.mxu1 %vm349_vm0, %v313_v3  ;;  %v1203_v5 = vld [vmem:[%s1787_s2 + $0x10] sm:$0xf]  ;;  %s281_s8 = scalar_select %p280_p13, %s1404_s18, 7  ;;  %1194 = vmatpush.msk.msra.mxu3 %vm349_vm0, %v1193_v4  ;;  %v1233_v6 = vld [vmem:[%s1787_s2 + $0x1c] sm:$0xf]  ;;  %vm324_vm1 = vcmask 31744  }
  0x19   : > { %1224 = vmatpush.msk.msrb.mxu2 %vm349_vm0, %v1223_v2  ;;  %1204 = vmatpush.msk.msrb.mxu0 %vm349_vm0, %v1203_v5  ;;  %v1213_v7 = vld [vmem:[%s1787_s2 + $0x14] sm:$0xf]  ;;  %s1249_s13 = smul.u32 80, %s1537_s24  ;;  %s275_s24 = sand.u32 1, %s1396_s16  }
  0x1a   : > { %1234 = vmatpush.msk.msrb.mxu3 %vm349_vm0, %v1233_v6  ;;  %1214 = vmatpush.msk.msrb.mxu1 %vm349_vm0, %v1213_v7  ;;  %s1248_s14 = smul.u32 10, %s281_s8  ;;  %s287_s8 = sadd.s32 1, %s1404_s18 }
  0x1b   : > { %p290_p0 = scmp.lt.s32.totalorder %s287_s8, 7 }
  0x1c   : > { %s284_s23 = sadd.s32 %s1249_s13, %s1248_s14 }
  0x1d   : > { %s1162_s27 = sshll.u32 %s284_s23, 3  ;;  %s1806_s8 = smov (!%p290_p0, %s287_s8), 7 }
  0x1e   : > { %s1564_s6 = scalar_lea.vmem %s1785_s0, %s1162_s27  ;;  %s1250_s9 = smul.u32 10, %s1806_s8 }
  0x1f   : > { %v314_v8 = vld [vmem:[%s1564_s6 + $0x1] sm:$0xff]  ;;  %v548_v11 = vld [vmem:[%s1564_s6 + $0x9] sm:$0xff]  ;;  %v549_v13 = vld [vmem:[%s1564_s6 + $0x11] sm:$0xff]  ;;  %s1244_s8 = sshll.u32 %s1404_s18, 3 }
  0x20   : > { %v462_v9 = vld [vmem:[%s1564_s6 + $0x8] sm:$0xff]  ;;  %v305_v10 = vld [vmem:[%s1564_s6] sm:$0xff]  ;;  %1166 = vmatmul.msk.f32.vlgmr.msra.gmra.mxu0 %vm324_vm1, %v314_v8  ;;  %1195 = vmatmul.msk.f32.vlgmr.msra.gmra.mxu3 %vm324_vm1, %v548_v11  ;;  %v463_v12 = vld [vmem:[%s1564_s6 + $0x10] sm:$0xff]  ;;  %s294_s10 = sadd.s32 %s1250_s9, %s1249_s13  ;;  %s1161_s13 = sshll.u32 %s275_s24, 6 }
  0x21   : > { %1185 = vmatmul.msk.f32.vlgmr.msra.gmra.mxu2 %vm324_vm1, %v462_v9  ;;  %1175 = vmatmul.msk.f32.vlgmr.msra.gmra.mxu1 %vm324_vm1, %v305_v10  ;;  %v464_v14 = vld [vmem:[%s1564_s6 + $0x18] sm:$0xff]  ;;  %v465_v16 = vld [vmem:[%s1564_s6 + $0x20] sm:$0xff]  ;;  %v466_v18 = vld [vmem:[%s1564_s6 + $0x28] sm:$0xff]  ;;  %s1163_s11 = sshll.u32 %s294_s10, 3  ;;  %s1709_s5 = scalar_lea.vmem [#allocation2], %s1161_s13 }
  0x22   : > { %v550_v15 = vld [vmem:[%s1564_s6 + $0x19] sm:$0xff]  ;;  %v551_v17 = vld [vmem:[%s1564_s6 + $0x21] sm:$0xff]  ;;  %v552_v19 = vld [vmem:[%s1564_s6 + $0x29] sm:$0xff]  ;;  %s1622_s23 = scalar_lea.vmem %s1786_s1, %s1163_s11  ;;  %s1014_s12 = sshll.u32 %s1709_s5, 4  ;;  %s1015_s12 = int_to_ptr.vmem [resolvable:$true] %s1014_s12 }
  0x23   : > { %v467_v20 = vld [vmem:[%s1564_s6 + $0x30] sm:$0xff]  ;;  %v468_v22 = vld [vmem:[%s1564_s6 + $0x38] sm:$0xff]  ;;  %v469_v24 = vld [vmem:[%s1564_s6 + $0x40] sm:$0xff] }
  0x24   : > { %v553_v21 = vld [vmem:[%s1564_s6 + $0x31] sm:$0xff]  ;;  %v554_v23 = vld [vmem:[%s1564_s6 + $0x39] sm:$0xff]  ;;  %v555_v25 = vld [vmem:[%s1564_s6 + $0x41] sm:$0xff]  ;;  %s1251_s6 = smul.u32 56, %s1408_s19 }
  0x25   : > { %v634_v26 = vld [vmem:[%s1622_s23] sm:$0xff]  ;;  %v806_v27 = vld [vmem:[%s1622_s23 + $0x8] sm:$0xff]  ;;  %v807_v30 = vld [vmem:[%s1622_s23 + $0x10] sm:$0xff] }
  0x26   : > { %v720_v28 = vld [vmem:[%s1622_s23 + $0x1] sm:$0xff]  ;;  %v892_v29 = vld [vmem:[%s1622_s23 + $0x9] sm:$0xff]  ;;  %v893_v31 = vld [vmem:[%s1622_s23 + $0x11] sm:$0xff]  ;;  %s1011_s9 = sadd.s32 %s1251_s6, %s1244_s8  ;;  %s1346_s8 = scalar_lea.hbm %s1789_s4, 896 }
  0x27   : > { %v808_v32 = vld [vmem:[%s1622_s23 + $0x18] sm:$0xff]  ;;  %v809_v34 = vld [vmem:[%s1622_s23 + $0x20] sm:$0xff]  ;;  %v810_v36 = vld [vmem:[%s1622_s23 + $0x28] sm:$0xff]  ;;  %s1245_s19 = sshll.u32 %s1011_s9, 3 }
  0x28   : > { %1167 = vmatmul.msk.f32.gmra.mxu0 %vm324_vm1, %v548_v11  ;;  %1196 = vmatmul.msk.f32.gmra.mxu3 %vm324_vm1, %v549_v13  ;;  %v894_v33 = vld [vmem:[%s1622_s23 + $0x19] sm:$0xff]  ;;  %v895_v35 = vld [vmem:[%s1622_s23 + $0x21] sm:$0xff]  ;;  %v896_v37 = vld [vmem:[%s1622_s23 + $0x29] sm:$0xff]  ;;  %s1013_s11 = scalar_lea.hbm %s1789_s4, %s1245_s19 }
  0x29   : > { %1186 = vmatmul.msk.f32.gmra.mxu2 %vm324_vm1, %v463_v12  ;;  %1176 = vmatmul.msk.f32.gmra.mxu1 %vm324_vm1, %v462_v9  ;;  %v811_v38 = vld [vmem:[%s1622_s23 + $0x30] sm:$0xff]  ;;  %v812_v40 = vld [vmem:[%s1622_s23 + $0x38] sm:$0xff]  ;;  %v813_v42 = vld [vmem:[%s1622_s23 + $0x40] sm:$0xff]  ;;  %s1016_s14 = sshll.u32 %s1013_s11, 4  ;;  %s1017_s14 = int_to_ptr.hbm [resolvable:$true] %s1016_s14 }
  0x2a   : > { %v897_v39 = vld [vmem:[%s1622_s23 + $0x31] sm:$0xff]  ;;  %v898_v41 = vld [vmem:[%s1622_s23 + $0x39] sm:$0xff]  ;;  %v899_v43 = vld [vmem:[%s1622_s23 + $0x41] sm:$0xff]  ;;  %s999_s23 = scalar_lea.sflag [#allocation3], %s275_s24  ;;  %s1340_s13 = sshra.s32 %s1017_s14, 4  ;;  %s1341_s13 = int_to_ptr.hbm [resolvable:$true] %s1340_s13 }
  0x2b   : > { %s1342_s27 = scalar_lea.hbm %s1341_s13, 64  ;;  %p1347_p5 = scmp.lt.s32.totalorder %s1341_s13, %s1789_s4 }
  0x2c   : > { %p1343_p1 = scmp.ne.s32.totalorder %s1341_s13, %s1342_s27  ;;  %p1348_p6 = scmp.lt.s32.totalorder %s1346_s8, %s1342_s27 }
  0x2e   : > { %p1344_p2 = pnand %p1343_p1, %p1500_p3  ;;  %p1349_p7 = por %p1348_p6, %p1347_p5 }
  0x30   : > { %1168 = vmatmul.msk.f32.gmra.mxu0 %vm324_vm1, %v549_v13  ;;  %1197 = vmatmul.msk.f32.gmra.mxu3 %vm324_vm1, %v550_v15  ;;  %p1345_p4 = pneg %p1344_p2 }
  0x31   : > { %1187 = vmatmul.msk.f32.gmra.mxu2 %vm324_vm1, %v464_v14  ;;  %1177 = vmatmul.msk.f32.gmra.mxu1 %vm324_vm1, %v463_v12 }
  0x32   : > { %p1350_p9 = pnand %p1349_p7, %p1345_p4 }
  0x38   : > { %1169 = vmatmul.msk.f32.gmra.mxu0 %vm324_vm1, %v550_v15  ;;  %1198 = vmatmul.msk.f32.gmra.mxu3 %vm324_vm1, %v551_v17 }
  0x39   : > { %1188 = vmatmul.msk.f32.gmra.mxu2 %vm324_vm1, %v465_v16  ;;  %1178 = vmatmul.msk.f32.gmra.mxu1 %vm324_vm1, %v464_v14 }
  0x40   : > { %1170 = vmatmul.msk.f32.gmra.mxu0 %vm324_vm1, %v551_v17  ;;  %1199 = vmatmul.msk.f32.gmra.mxu3 %vm324_vm1, %v552_v19 }
  0x41   : > { %1189 = vmatmul.msk.f32.gmra.mxu2 %vm324_vm1, %v466_v18  ;;  %1179 = vmatmul.msk.f32.gmra.mxu1 %vm324_vm1, %v465_v16 }
  0x48   : > { %1171 = vmatmul.msk.f32.gmra.mxu0 %vm324_vm1, %v552_v19  ;;  %1200 = vmatmul.msk.f32.gmra.mxu3 %vm324_vm1, %v553_v21 }
  0x49   : > { %1190 = vmatmul.msk.f32.gmra.mxu2 %vm324_vm1, %v467_v20  ;;  %1180 = vmatmul.msk.f32.gmra.mxu1 %vm324_vm1, %v466_v18 }
  0x50   : > { %1172 = vmatmul.msk.f32.gmra.mxu0 %vm324_vm1, %v553_v21  ;;  %1201 = vmatmul.msk.f32.gmra.mxu3 %vm324_vm1, %v554_v23 }
  0x51   : > { %1191 = vmatmul.msk.f32.gmra.mxu2 %vm324_vm1, %v468_v22  ;;  %1181 = vmatmul.msk.f32.gmra.mxu1 %vm324_vm1, %v467_v20 }
  0x58   : > { %1173 = vmatmul.msk.f32.gmra.mxu0 %vm324_vm1, %v554_v23  ;;  %1202 = vmatmul.msk.f32.gmra.mxu3 %vm324_vm1, %v555_v25  ;;  %v1706_v25 = vld [vmem:[%s1788_s3] ss:$0 sm:$0xff] }
  0x59   : > { %1192 = vmatmul.msk.f32.gmra.mxu2 %vm324_vm1, %v469_v24  ;;  %1182 = vmatmul.msk.f32.gmra.mxu1 %vm324_vm1, %v468_v22 }
  0x60   : > { %1205 = vmatmul.msk.f32.vlgmr.msrb.gmra.mxu0 %vm324_vm1, %v634_v26  ;;  %1235 = vmatmul.msk.f32.vlgmr.msrb.gmra.mxu3 %vm324_vm1, %v892_v29 }
  0x61   : > { %1225 = vmatmul.msk.f32.vlgmr.msrb.gmra.mxu2 %vm324_vm1, %v806_v27  ;;  %1215 = vmatmul.msk.f32.vlgmr.msrb.gmra.mxu1 %vm324_vm1, %v720_v28 }
  0x68   : > { %1206 = vmatmul.msk.f32.gmra.mxu0 %vm324_vm1, %v806_v27  ;;  %1236 = vmatmul.msk.f32.gmra.mxu3 %vm324_vm1, %v893_v31 }
  0x69   : > { %1226 = vmatmul.msk.f32.gmra.mxu2 %vm324_vm1, %v807_v30  ;;  %1216 = vmatmul.msk.f32.gmra.mxu1 %vm324_vm1, %v892_v29 }
  0x70   : > { %1207 = vmatmul.msk.f32.gmra.mxu0 %vm324_vm1, %v807_v30  ;;  %1237 = vmatmul.msk.f32.gmra.mxu3 %vm324_vm1, %v894_v33 }
  0x71   : > { %1227 = vmatmul.msk.f32.gmra.mxu2 %vm324_vm1, %v808_v32  ;;  %1217 = vmatmul.msk.f32.gmra.mxu1 %vm324_vm1, %v893_v31 }
  0x78   : > { %1208 = vmatmul.msk.f32.gmra.mxu0 %vm324_vm1, %v808_v32  ;;  %1238 = vmatmul.msk.f32.gmra.mxu3 %vm324_vm1, %v895_v35 }
  0x79   : > { %1228 = vmatmul.msk.f32.gmra.mxu2 %vm324_vm1, %v809_v34  ;;  %1218 = vmatmul.msk.f32.gmra.mxu1 %vm324_vm1, %v894_v33 }
  0x80   : > { %1209 = vmatmul.msk.f32.gmra.mxu0 %vm324_vm1, %v809_v34  ;;  %1239 = vmatmul.msk.f32.gmra.mxu3 %vm324_vm1, %v896_v37 }
  0x81   : > { %1229 = vmatmul.msk.f32.gmra.mxu2 %vm324_vm1, %v810_v36  ;;  %1219 = vmatmul.msk.f32.gmra.mxu1 %vm324_vm1, %v895_v35 }
  0x88   : > { %1210 = vmatmul.msk.f32.gmra.mxu0 %vm324_vm1, %v810_v36  ;;  %1240 = vmatmul.msk.f32.gmra.mxu3 %vm324_vm1, %v897_v39 }
  0x89   : > { %1230 = vmatmul.msk.f32.gmra.mxu2 %vm324_vm1, %v811_v38  ;;  %1220 = vmatmul.msk.f32.gmra.mxu1 %vm324_vm1, %v896_v37 }
  0x90   : > { %1211 = vmatmul.msk.f32.gmra.mxu0 %vm324_vm1, %v811_v38  ;;  %1241 = vmatmul.msk.f32.gmra.mxu3 %vm324_vm1, %v898_v41 }
  0x91   : > { %1231 = vmatmul.msk.f32.gmra.mxu2 %vm324_vm1, %v812_v40  ;;  %1221 = vmatmul.msk.f32.gmra.mxu1 %vm324_vm1, %v897_v39 }
  0x98   : > { %1212 = vmatmul.msk.f32.gmra.mxu0 %vm324_vm1, %v812_v40  ;;  %1242 = vmatmul.msk.f32.gmra.mxu3 %vm324_vm1, %v899_v43 }
  0x99   : > { %1232 = vmatmul.msk.f32.gmra.mxu2 %vm324_vm1, %v813_v42  ;;  %1222 = vmatmul.msk.f32.gmra.mxu1 %vm324_vm1, %v898_v41 }
  0x9d   : > { %v370_v44 = vpop.f32.mrf.mxu0 }
  0x9e   : > { %v438_v45 = vpop.f32.mrf.mxu1 }
  0x9f   : > { %v439_v9 = vadd.f32 %v438_v45, %v370_v44 }
  0xa3   : > { %v602_v47 = vpop.f32.mrf.mxu3 }
  0xa4   : > { %v516_v46 = vpop.f32.mrf.mxu2 }
  0xa5   : > { %v373_v48 = vpop.f32.mrf.mxu0  ;;  %v540_v11 = vadd.f32 %v516_v46, %v439_v9 }
  0xa6   : > { %v441_v49 = vpop.f32.mrf.mxu1 }
  0xa7   : > { %v626_v13 = vadd.f32 %v602_v47, %v540_v11  ;;  %v442_v16 = vadd.f32 %v441_v49, %v373_v48 }
  0xab   : > { %v605_v51 = vpop.f32.mrf.mxu3 }
  0xac   : > { %v519_v50 = vpop.f32.mrf.mxu2 }
  0xad   : > { %v376_v52 = vpop.f32.mrf.mxu0  ;;  %v541_v19 = vadd.f32 %v519_v50, %v442_v16 }
  0xae   : > { %v444_v53 = vpop.f32.mrf.mxu1 }
  0xaf   : > { %v627_v22 = vadd.f32 %v605_v51, %v541_v19  ;;  %v445_v27 = vadd.f32 %v444_v53, %v376_v52 }
  0xb3   : > { %v608_v55 = vpop.f32.mrf.mxu3 }
  0xb4   : > { %v522_v54 = vpop.f32.mrf.mxu2 }
  0xb5   : > { %v379_v56 = vpop.f32.mrf.mxu0  ;;  %v542_v31 = vadd.f32 %v522_v54, %v445_v27 }
  0xb6   : > { %v447_v57 = vpop.f32.mrf.mxu1 }
  0xb7   : > { %v628_v35 = vadd.f32 %v608_v55, %v542_v31  ;;  %v448_v39 = vadd.f32 %v447_v57, %v379_v56 }
  0xbb   : > { %v611_v59 = vpop.f32.mrf.mxu3 }
  0xbc   : > { %v525_v58 = vpop.f32.mrf.mxu2 }
  0xbd   : > { %v382_v60 = vpop.f32.mrf.mxu0  ;;  %v543_v43 = vadd.f32 %v525_v58, %v448_v39 }
  0xbe   : > { %v450_v61 = vpop.f32.mrf.mxu1 }
  0xbf   : > { %v629_v47 = vadd.f32 %v611_v59, %v543_v43  ;;  %v451_v51 = vadd.f32 %v450_v61, %v382_v60 }
  0xc3   : > { %v1674_v63 = vpop.f32.mrf.mxu3 }
  0xc4   : > { %v528_v62 = vpop.f32.mrf.mxu2 }
  0xc5   : > { %v1676_v0 = vpop.f32.mrf.mxu0  ;;  %v544_v55 = vadd.f32 %v528_v62, %v451_v51 }
  0xc6   : > { %v1678_v1 = vpop.f32.mrf.mxu1 }
  0xc7   : > { %v630_v9 = vadd.f32 %v1674_v63, %v544_v55  ;;  %v454_v59 = vadd.f32 %v1678_v1, %v1676_v0 }
  0xcb   : > { %v1682_v3 = vpop.f32.mrf.mxu3 }
  0xcc   : > { %v1680_v2 = vpop.f32.mrf.mxu2 }
  0xcd   : > { %v1684_v4 = vpop.f32.mrf.mxu0 }
  0xce   : > { %v1686_v5 = vpop.f32.mrf.mxu1 }
  0xd3   : > { %v1690_v7 = vpop.f32.mrf.mxu3 }
  0xd4   : > { %v1688_v6 = vpop.f32.mrf.mxu2 }
  0xd5   : > { %v1692_v8 = vpop.f32.mrf.mxu0 }
  0xd6   : > { %v1694_v10 = vpop.f32.mrf.mxu1 }
  0xdb   : > { %v1698_v14 = vpop.f32.mrf.mxu3 }
  0xdc   : > { %v1696_v12 = vpop.f32.mrf.mxu2 }
  0xdd   : > { %v688_v15 = vpop.f32.mrf.mxu0 }
  0xde   : > { %v712_v17 = vadd.f32 %v688_v15, %v626_v13  ;;  %v774_v18 = vpop.f32.mrf.mxu1 }
  0xe0   : > { %v798_v20 = vadd.f32 %v774_v18, %v712_v17  ;;  %v545_v17 = vadd.f32 %v1680_v2, %v454_v59 }
  0xe3   : > { %v946_v24 = vpop.f32.mrf.mxu3 }
  0xe4   : > { %v860_v21 = vpop.f32.mrf.mxu2 }
  0xe5   : > { %v884_v23 = vadd.f32 %v860_v21, %v798_v20  ;;  %v691_v26 = vpop.f32.mrf.mxu0  ;;  %v631_v20 = vadd.f32 %v1682_v3, %v545_v17 }
  0xe6   : > { %v713_v28 = vadd.f32 %v691_v26, %v627_v22  ;;  %v777_v30 = vpop.f32.mrf.mxu1 }
  0xe7   : > { %v970_v29 = vadd.f32 %v946_v24, %v884_v23  ;;  %v457_v23 = vadd.f32 %v1686_v5, %v1684_v4  ;;  %v460_v4 = vadd.f32 %v1694_v10, %v1692_v8 }
  0xe8   : > { %v799_v33 = vadd.f32 %v777_v30, %v713_v28 }
  0xe9   : > { %v982_v32 = vadd.f32 %v1706_v25, %v970_v29  ;;  %v546_v26 = vadd.f32 %v1688_v6, %v457_v23  ;;  %v547_v6 = vadd.f32 %v1696_v12, %v460_v4 }
  0xeb   : > { %990 = vst [vmem:[%s1709_s5] sm:$0xff] %v982_v32  ;;  %v949_v37 = vpop.f32.mrf.mxu3  ;;  %v632_v3 = vadd.f32 %v1690_v7, %v546_v26  ;;  %v633_v7 = vadd.f32 %v1698_v14, %v547_v6 }
  0xec   : > { %v863_v34 = vpop.f32.mrf.mxu2 }
  0xed   : > { %v885_v36 = vadd.f32 %v863_v34, %v799_v33  ;;  %v694_v38 = vpop.f32.mrf.mxu0 }
  0xee   : > { %v714_v40 = vadd.f32 %v694_v38, %v628_v35  ;;  %v780_v42 = vpop.f32.mrf.mxu1 }
  0xef   : > { %v971_v41 = vadd.f32 %v949_v37, %v885_v36 }
  0xf0   : > { %v800_v45 = vadd.f32 %v780_v42, %v714_v40 }
  0xf1   : > { %v983_v44 = vadd.f32 %v1706_v25, %v971_v41 }
  0xf3   : > { %991 = vst [vmem:[%s1709_s5 + $0x8] sm:$0xff] %v983_v44  ;;  %v952_v49 = vpop.f32.mrf.mxu3 }
  0xf4   : > { %v866_v46 = vpop.f32.mrf.mxu2 }
  0xf5   : > { %v886_v48 = vadd.f32 %v866_v46, %v800_v45  ;;  %v697_v50 = vpop.f32.mrf.mxu0 }
  0xf6   : > { %v715_v52 = vadd.f32 %v697_v50, %v629_v47  ;;  %v783_v54 = vpop.f32.mrf.mxu1 }
  0xf7   : > { %v972_v53 = vadd.f32 %v952_v49, %v886_v48 }
  0xf8   : > { %v801_v57 = vadd.f32 %v783_v54, %v715_v52 }
  0xf9   : > { %v984_v56 = vadd.f32 %v1706_v25, %v972_v53 }
  0xfb   : > { %992 = vst [vmem:[%s1709_s5 + $0x10] sm:$0xff] %v984_v56  ;;  %v955_v13 = vpop.f32.mrf.mxu3 }
  0xfc   : > { %v869_v58 = vpop.f32.mrf.mxu2 }
  0xfd   : > { %v887_v11 = vadd.f32 %v869_v58, %v801_v57  ;;  %v700_v15 = vpop.f32.mrf.mxu0 }
  0xfe   : > { %v716_v16 = vadd.f32 %v700_v15, %v630_v9  ;;  %v786_v61 = vpop.f32.mrf.mxu1 }
  0xff   : > { %v973_v60 = vadd.f32 %v955_v13, %v887_v11 }
 0x100   : > { %v802_v18 = vadd.f32 %v786_v61, %v716_v16 }
 0x101   : > { %v985_v62 = vadd.f32 %v1706_v25, %v973_v60 }
 0x103   : > { %993 = vst [vmem:[%s1709_s5 + $0x18] sm:$0xff] %v985_v62  ;;  %v958_v21 = vpop.f32.mrf.mxu3 }
 0x104   : > { %v872_v19 = vpop.f32.mrf.mxu2 }
 0x105   : > { %v888_v63 = vadd.f32 %v872_v19, %v802_v18  ;;  %v703_v22 = vpop.f32.mrf.mxu0 }
 0x106   : > { %v717_v0 = vadd.f32 %v703_v22, %v631_v20  ;;  %v789_v24 = vpop.f32.mrf.mxu1 }
 0x107   : > { %v974_v1 = vadd.f32 %v958_v21, %v888_v63 }
 0x108   : > { %v803_v27 = vadd.f32 %v789_v24, %v717_v0 }
 0x109   : > { %v986_v2 = vadd.f32 %v1706_v25, %v974_v1 }
 0x10b   : > { %994 = vst [vmem:[%s1709_s5 + $0x20] sm:$0xff] %v986_v2  ;;  %v961_v30 = vpop.f32.mrf.mxu3 }
 0x10c   : > { %v875_v28 = vpop.f32.mrf.mxu2 }
 0x10d   : > { %v889_v29 = vadd.f32 %v875_v28, %v803_v27  ;;  %v706_v31 = vpop.f32.mrf.mxu0 }
 0x10e   : > { %v718_v5 = vadd.f32 %v706_v31, %v632_v3  ;;  %v792_v33 = vpop.f32.mrf.mxu1 }
 0x10f   : > { %v975_v32 = vadd.f32 %v961_v30, %v889_v29 }
 0x110   : > { %v804_v35 = vadd.f32 %v792_v33, %v718_v5 }
 0x111   : > { %v987_v34 = vadd.f32 %v1706_v25, %v975_v32 }
 0x113   : > { %995 = vst [vmem:[%s1709_s5 + $0x28] sm:$0xff] %v987_v34  ;;  %v964_v38 = vpop.f32.mrf.mxu3 }
 0x114   : > { %v878_v36 = vpop.f32.mrf.mxu2 }
 0x115   : > { %v890_v37 = vadd.f32 %v878_v36, %v804_v35  ;;  %v709_v8 = vpop.f32.mrf.mxu0 }
 0x116   : > { %v719_v10 = vadd.f32 %v709_v8, %v633_v7  ;;  %v795_v12 = vpop.f32.mrf.mxu1 }
 0x117   : > { %v976_v39 = vadd.f32 %v964_v38, %v890_v37 }
 0x118   : > { %v805_v41 = vadd.f32 %v795_v12, %v719_v10 }
 0x119   : > { %v988_v40 = vadd.f32 %v1706_v25, %v976_v39 }
 0x11b   : > { %996 = vst [vmem:[%s1709_s5 + $0x30] sm:$0xff] %v988_v40  ;;  %v967_v43 = vpop.f32.mrf.mxu3 }
 0x11c   : > { %v881_v42 = vpop.f32.mrf.mxu2 }
 0x11d   : > { %v891_v14 = vadd.f32 %v881_v42, %v805_v41 }
 0x11f   : > { %v977_v44 = vadd.f32 %v967_v43, %v891_v14 }
 0x121   : > { %v989_v45 = vadd.f32 %v1706_v25, %v977_v44 }
 0x123   : > { %997 = vst [vmem:[%s1709_s5 + $0x38] sm:$0xff] %v989_v45 }
 0x124   : > { %1353 = shalt.err (!%p1350_p9)
}
 0x125   : > { %s1422_s24 = smov 128   ;;  %s1423_s5 = smov 8  }
 0x126   : > { %1252 = dma.vmem_to_hbm [thread:$0]  (%p1500_p3), %s1015_s12, 1024, %s1017_s14, %s999_s23, %s1422_s24, %s1422_s24, %s1423_s5  }
 0x127 PF: > { %p1258_p10 = scmp.ge.s32.totalorder %s1420_s22, 2  ;;  %s1031_s10 = sand.u32 1, %s1392_s15  }
 0x128   : > { %s1032_s18 = scalar_lea.sflag [#allocation3], %s1031_s10 }
 0x129   : > { %p1255_p11 = pnand %p1258_p10, %p1509_p8 }
 0x12b   : > { %p1256_p12 = pneg %p1255_p11 }
 0x12d   : > { %1387 = dma.done.wait (%p1256_p12), %s1032_s18, 1024  }
 0x12e   : > { %1389 = vsyncadd (%p1256_p12), %s1032_s18, 4294966272  ;;  %s17_s22 = sadd.s32 1, %s1420_s22   ;;  %s1792_s15 = smov %s1396_s16 }
 0x12f   : > { %p14_p13 = scmp.ge.s32.totalorder %s17_s22, 16   ;;  %s1793_s16 = smov %s1400_s17 }
 0x130   : > { %s1794_s17 = smov %s1518_s7  ;;  %s1795_s18 = smov %s1412_s20 }
 0x131   : > { %s1796_s19 = smov %s1416_s21  ;;  %s1797_s20 = smov %s1800_s25 }
 0x132   : > { %s1798_s21 = smov %s1804_s26  ;;  %16 = sbr.rel (!%p14_p13) target bundleno = 5 (0x5), region = 87 }
 0x137   :  { %1038 = vsyncpa [#allocation3], 1 }
 0x138   :  { %1040 = vsyncpa [#allocation3 + $0x1], 1 }

</bundles_post_ra>
